<compile_context>
chip_gen: v6e
topology: v6e:2x2x1
jax: 0.10.0
libtpu: 0.0.40
codegen_flags: <defaults>
</compile_context>

<pallas_src>
import math
import functools

import jax
import jax.numpy as jnp
from jax.experimental import pallas as pl
from jax.experimental.pallas import tpu as pltpu


def _round_up(v, m):
    return ((v + m - 1) // m) * m


def _pad2(x, rows, cols):
    r, c = x.shape
    if r == rows and c == cols:
        return x
    return jnp.zeros((rows, cols), x.dtype).at[:r, :c].set(x)


def _vmem_limit_bytes():
    cap = 64 << 20                      # conservative fallback = v7x physical VMEM
    try:
        info = pltpu.get_tpu_info()
        cap = int(getattr(info, "vmem_capacity_bytes", cap))
    except Exception:
        pass
    return max((cap * 3) // 4, 32 << 20)


def _cparams(dimension_semantics):
    return pltpu.CompilerParams(dimension_semantics=dimension_semantics,
                                vmem_limit_bytes=_vmem_limit_bytes())


# ----------------------------- projection kernels -----------------------------

def _proj_kernel(x_ref, w_ref, a_ref, xlin_ref, alpha_ref, *, out_ch, c_pad):
    """res_fc is None: only x_lin (bf16, head-padded, with ones column) and alpha."""
    xb = x_ref[...].astype(jnp.bfloat16)
    xlin = jnp.dot(xb, w_ref[...], preferred_element_type=jnp.float32)      # [TM, HCP]
    alpha_ref[...] = jnp.dot(xlin, a_ref[...], preferred_element_type=jnp.float32)
    # lane `out_ch` of each 128-wide head block := 1.0  (denominator column trick)
    col = jax.lax.broadcasted_iota(jnp.int32, xlin.shape, 1)
    xlin = jnp.where(col % c_pad == out_ch, 1.0, xlin)
    xlin_ref[...] = xlin.astype(jnp.bfloat16)


def _proj_kernel_res(x_ref, w_ref, a_ref, wres_ref, bias_ref,
                     xlin_ref, alpha_ref, resbias_ref, *, out_ch, c_pad):
    """Separate residual projection (in_ch != heads*out_ch)."""
    xb = x_ref[...].astype(jnp.bfloat16)
    xlin = jnp.dot(xb, w_ref[...], preferred_element_type=jnp.float32)      # [TM, HCP]
    alpha_ref[...] = jnp.dot(xlin, a_ref[...], preferred_element_type=jnp.float32)
    resbias_ref[...] = (jnp.dot(xb, wres_ref[...], preferred_element_type=jnp.float32)
                        + bias_ref[...])
    col = jax.lax.broadcasted_iota(jnp.int32, xlin.shape, 1)
    xlin = jnp.where(col % c_pad == out_ch, 1.0, xlin)
    xlin_ref[...] = xlin.astype(jnp.bfloat16)


# ------------------------------ attention kernel ------------------------------

def _attn_kernel(*refs, heads, out_ch, c_pad, neg_slope, res_proj):
    """Grid = (row tiles of targets ["parallel"], column chunks of sources ["arbitrary"]).

    alpha_ref    : [TM, ALPHA_PAD] f32  cols [0,H)=att_l  [H,2H)=att_r  [2H,3H)=m bound
    alphal_t_ref : [H, TK]         f32  att_l scores of this source chunk
    adj_ref      : [TM, TK]        bf16 edge multiplicity (row = target)
    xlin_ref     : [TK, H*Cpad]    bf16 projected sources (lane out_ch of each head = 1)
    res*_ref     : residual operands (see below)
    out_ref      : [TM, H*Cpad]    f32  resident accumulator across the column axis
    """
    alpha_ref, alphal_t_ref, adj_ref, xlin_ref = refs[:4]
    if res_proj:
        resbias_ref, out_ref = refs[4:6]
    else:
        xlin_row_ref, bias_ref, out_ref = refs[4:7]

    kcol = pl.program_id(1)

    @pl.when(kcol == 0)
    def _():
        out_ref[...] = jnp.zeros_like(out_ref)

    adj = adj_ref[...].astype(jnp.float32)                  # [TM, TK]
    pieces = []
    for h in range(heads):                                  # static unroll over heads
        ar = alpha_ref[:, heads + h:heads + h + 1]          # [TM, 1]  <x_i, att_r>
        m = alpha_ref[:, 2 * heads + h:2 * heads + h + 1]   # [TM, 1]  analytic max bound
        al = alphal_t_ref[h:h + 1, :]                       # [1, TK]  <x_j, att_l>
        e = ar + al                                         # [TM, TK]
        e = jnp.where(e >= 0.0, e, neg_slope * e)           # leaky_relu
        # m >= e for every column (global bound), so exp(e - m) <= 1: no overflow,
        # and the softmax ratio is independent of the shift.
        num = adj * jnp.exp(e - m)                          # [TM, TK] f32
        xl_h = xlin_ref[:, h * c_pad:(h + 1) * c_pad]       # [TK, Cpad] bf16 (tile-aligned)
        # bf16 MXU aggregation; the ones column of xl_h yields the denominator for free.
        pieces.append(jnp.dot(num.astype(jnp.bfloat16), xl_h,
                              preferred_element_type=jnp.float32))
    chunk = pieces[0] if heads == 1 else jnp.concatenate(pieces, axis=-1)
    out_ref[...] += chunk                                   # lane-dense accumulate

    @pl.when(kcol == pl.num_programs(1) - 1)
    def _():
        acc = out_ref[...]                                  # [TM, HCP]
        outs = []
        for h in range(heads):
            acc_h = acc[:, h * c_pad:(h + 1) * c_pad]
            den = jnp.maximum(acc_h[:, out_ch:out_ch + 1], 1e-30)   # denominator column
            outs.append(acc_h * pl.reciprocal(den, approx=True))    # post-agg normalize
        agg = outs[0] if heads == 1 else jnp.concatenate(outs, axis=-1)
        if res_proj:
            agg = agg + resbias_ref[...]
        else:
            agg = agg + xlin_row_ref[...].astype(jnp.float32) + bias_ref[...]
        out_ref[...] = agg                                  # single lane-dense store


# --------------------------------- layer wrapper -------------------------------

def agdn_conv(x_pad, adj_bf, params, *, heads, out_ch, neg_slope=0.2, tm=256, tk=1024):
    """x_pad: [Npad, FinPad] f32 (zero-padded).  adj_bf: [Npad, Npad] bf16.
    Returns [Npad, heads*Cpad] f32 head-padded output (real features in the first
    out_ch lanes of each 128-wide head block)."""
    n_pad, fin_pad = x_pad.shape
    c_pad = _round_up(out_ch + 1, 128)         # +1 lane for the denominator column
    hcp = heads * c_pad
    alpha_pad = _round_up(3 * heads, 128)
    assert n_pad % tm == 0 and n_pad % tk == 0 and tm % 8 == 0 and tk % 128 == 0

    # ---- head-padded constants (bf16 weights, f32 attention matrix / bias) ----
    w = params["w"].astype(jnp.float32)        # [in_ch, heads*out_ch]
    in_ch = w.shape[0]
    w_hp = jnp.zeros((fin_pad, hcp), jnp.float32)
    a_hp = jnp.zeros((hcp, alpha_pad), jnp.float32)
    bias_hp = jnp.zeros((1, hcp), jnp.float32)
    for h in range(heads):
        w_hp = w_hp.at[:in_ch, h * c_pad:h * c_pad + out_ch].set(
            w[:, h * out_ch:(h + 1) * out_ch])
        a_hp = a_hp.at[h * c_pad:h * c_pad + out_ch, h].set(params["att_l"][h])
        a_hp = a_hp.at[h * c_pad:h * c_pad + out_ch, heads + h].set(params["att_r"][h])
        bias_hp = bias_hp.at[0, h * c_pad:h * c_pad + out_ch].set(
            params["bias"][h * out_ch:(h + 1) * out_ch])
    w_hp = w_hp.astype(jnp.bfloat16)

    res_proj = params["res_w"] is not None
    grid_rows = n_pad // tm

    def rtile(cols):
        return pl.BlockSpec((tm, cols), lambda i: (i, 0))

    def full2(shape):
        return pl.BlockSpec(shape, lambda i: (0, 0))

    # ---- projection pass (row-tiled, "parallel") ----
    if res_proj:
        wres = params["res_w"].astype(jnp.float32)
        wres_hp = jnp.zeros((fin_pad, hcp), jnp.float32)
        for h in range(heads):
            wres_hp = wres_hp.at[:in_ch, h * c_pad:h * c_pad + out_ch].set(
                wres[:, h * out_ch:(h + 1) * out_ch])
        wres_hp = wres_hp.astype(jnp.bfloat16)
        x_lin, alpha, resbias = pl.pallas_call(
            functools.partial(_proj_kernel_res, out_ch=out_ch, c_pad=c_pad),
            grid=(grid_rows,),
            in_specs=[rtile(fin_pad), full2(w_hp.shape), full2(a_hp.shape),
                      full2(wres_hp.shape), full2(bias_hp.shape)],
            out_specs=(rtile(hcp), rtile(alpha_pad), rtile(hcp)),
            out_shape=(jax.ShapeDtypeStruct((n_pad, hcp), jnp.bfloat16),
                       jax.ShapeDtypeStruct((n_pad, alpha_pad), jnp.float32),
                       jax.ShapeDtypeStruct((n_pad, hcp), jnp.float32)),
            compiler_params=_cparams(("parallel",)),
        )(x_pad, w_hp, a_hp, wres_hp, bias_hp)
    else:
        x_lin, alpha = pl.pallas_call(
            functools.partial(_proj_kernel, out_ch=out_ch, c_pad=c_pad),
            grid=(grid_rows,),
            in_specs=[rtile(fin_pad), full2(w_hp.shape), full2(a_hp.shape)],
            out_specs=(rtile(hcp), rtile(alpha_pad)),
            out_shape=(jax.ShapeDtypeStruct((n_pad, hcp), jnp.bfloat16),
                       jax.ShapeDtypeStruct((n_pad, alpha_pad), jnp.float32)),
            compiler_params=_cparams(("parallel",)),
        )(x_pad, w_hp, a_hp)
        resbias = None

    # ---- analytic softmax max bound m_i = leaky_relu(ar_i + max_j al_j) ----
    # (padding rows contribute al = 0, which only raises the bound; exp(e-m) <= 1.
    #  Like the PyTorch reference path this is an unmasked bound; pathological
    #  non-edge scores > ~88 above edge scores would underflow — not reachable
    #  with xavier-initialized inference-scale activations.)
    al = alpha[:, :heads]
    ar = alpha[:, heads:2 * heads]
    max_al = jnp.max(al, axis=0)
    m_col = ar + max_al[None, :]
    m_col = jnp.where(m_col >= 0.0, m_col, neg_slope * m_col)
    alpha = alpha.at[:, 2 * heads:3 * heads].set(m_col)
    alphal_t = jnp.transpose(al)                       # [H, Npad] source att_l scores

    # ---- attention / aggregation pass (row tiles x column chunks) ----
    in_specs = [
        pl.BlockSpec((tm, alpha_pad), lambda i, k: (i, 0)),   # target-row scores + m
        pl.BlockSpec((heads, tk), lambda i, k: (0, k)),       # source-chunk att_l
        pl.BlockSpec((tm, tk), lambda i, k: (i, k)),          # adj chunk (bf16)
        pl.BlockSpec((tk, hcp), lambda i, k: (k, 0)),         # x_lin source chunk (bf16)
    ]
    inputs = [alpha, alphal_t, adj_bf, x_lin]
    if res_proj:
        in_specs.append(pl.BlockSpec((tm, hcp), lambda i, k: (i, 0)))   # residual + bias
        inputs.append(resbias)
    else:
        in_specs.append(pl.BlockSpec((tm, hcp), lambda i, k: (i, 0)))   # x_lin row tile
        inputs.append(x_lin)
        in_specs.append(pl.BlockSpec((1, hcp), lambda i, k: (0, 0)))    # bias
        inputs.append(bias_hp)

    out = pl.pallas_call(
        functools.partial(_attn_kernel, heads=heads, out_ch=out_ch, c_pad=c_pad,
                          neg_slope=neg_slope, res_proj=res_proj),
        grid=(n_pad // tm, n_pad // tk),
        in_specs=in_specs,
        out_specs=pl.BlockSpec((tm, hcp), lambda i, k: (i, 0)),
        out_shape=jax.ShapeDtypeStruct((n_pad, hcp), jnp.float32),
        compiler_params=_cparams(("parallel", "arbitrary")),
    )(*inputs)
    return out


# ---------------- parameter init (deterministic, xavier-uniform like torch) ---------

def _xavier(key, shape, fan_in, fan_out):
    bound = math.sqrt(6.0 / (fan_in + fan_out))
    return jax.random.uniform(key, shape, jnp.float32, -bound, bound)


def init_agdn_conv(key, in_ch, out_ch, heads):
    k1, k2, k3, k4 = jax.random.split(key, 4)
    hc = heads * out_ch
    w = _xavier(k1, (in_ch, hc), in_ch, hc)                 # torch Linear weight, transposed
    att_l = _xavier(k2, (heads, out_ch), heads * out_ch, out_ch)
    att_r = _xavier(k3, (heads, out_ch), heads * out_ch, out_ch)
    res_w = None if in_ch == hc else _xavier(k4, (in_ch, hc), in_ch, hc)
    bias = jnp.zeros((hc,), jnp.float32)
    return dict(w=w, att_l=att_l, att_r=att_r, res_w=res_w, bias=bias), heads, out_ch


def init_agdn(key, in_ch, hidden, out_ch, num_layers=2, heads=1):
    keys = jax.random.split(key, num_layers)
    layers = [init_agdn_conv(keys[0], in_ch, hidden, heads)]
    for l in range(num_layers - 2):
        layers.append(init_agdn_conv(keys[l + 1], hidden * heads, hidden, heads))
    layers.append(init_agdn_conv(keys[-1], hidden * heads, out_ch, 1))
    return layers


# --------------------------------- full forward --------------------------------

def agdn_forward(layers, x, adj, tile_m=256, tile_n=1024):
    assert tile_m % 128 == 0 and tile_n % 128 == 0
    n = x.shape[0]
    n_pad = _round_up(n, 128)
    tm = min(tile_m, n_pad)
    tk = min(tile_n, n_pad)
    n_pad = _round_up(n_pad, tm * tk // math.gcd(tm, tk))

    adj_bf = _pad2(adj.astype(jnp.float32), n_pad, n_pad).astype(jnp.bfloat16)
    feat = x.astype(jnp.float32)
    for idx, (params, heads, out_ch) in enumerate(layers):
        x_pad = _pad2(feat, n_pad, _round_up(feat.shape[1], 128))
        y = agdn_conv(x_pad, adj_bf, params, heads=heads, out_ch=out_ch, tm=tm, tk=tk)
        c_pad = _round_up(out_ch + 1, 128)
        # head-padded [Npad, heads*Cpad] -> compact [n, heads*out_ch]  (layout plumbing)
        y = y[:n].reshape(n, heads, c_pad)[:, :, :out_ch].reshape(n, heads * out_ch)
        if idx < len(layers) - 1:
            y = jax.nn.elu(y)
            # dropout with p=0.0 (eval mode) is the identity
        feat = y
    return feat


# --------------------------- pure-JAX dense reference ---------------------------

def _agdn_conv_ref(x, adj, params, heads, out_ch, neg_slope=0.2):
    hc = heads * out_ch
    xlin = x @ params["w"]                                   # [N, hc]
    xl = xlin.reshape(-1, heads, out_ch)
    al = jnp.einsum("nhc,hc->nh", xl, params["att_l"])
    ar = jnp.einsum("nhc,hc->nh", xl, params["att_r"])
    e = al[None, :, :] + ar[:, None, :]                      # [Ni, Nj, H]
    e = jnp.where(e >= 0, e, neg_slope * e)
    e = e - jnp.max(e, axis=1, keepdims=True)
    num = adj[:, :, None] * jnp.exp(e)
    den = jnp.maximum(num.sum(axis=1, keepdims=True), 1e-30)
    wgt = num / den
    out = jnp.einsum("ijh,jhc->ihc", wgt, xl).reshape(-1, hc)
    res = xlin if params["res_w"] is None else x @ params["res_w"]
    return out + res + params["bias"][None, :]


def agdn_forward_ref(layers, x, adj):
    feat = x.astype(jnp.float32)
    for idx, (params, heads, out_ch) in enumerate(layers):
        feat = _agdn_conv_ref(feat, adj, params, heads, out_ch)
        if idx < len(layers) - 1:
            feat = jax.nn.elu(feat)
    return feat


if __name__ == "__main__":
    key = jax.random.PRNGKey(0)
    kx, ke, kp = jax.random.split(key, 3)

    N, E = 256, 1024
    in_ch, hidden, out_ch, heads, num_layers = 8, 16, 4, 2, 3

    x = jax.random.normal(kx, (N, in_ch), jnp.float32)

    # edge_index: [2, E], row 0 = source j, row 1 = target i (PyG convention)
    src = jax.random.randint(jax.random.fold_in(ke, 0), (E,), 0, N)
    dst = jax.random.randint(jax.random.fold_in(ke, 1), (E,), 0, N)
    edge_index = jnp.stack([src, dst])
    # dense multiplicity matrix: adj[i, j] = number of edges j -> i
    adj = jnp.zeros((N, N), jnp.float32).at[edge_index[1], edge_index[0]].add(1.0)

    layers = init_agdn(kp, in_ch, hidden, out_ch, num_layers=num_layers, heads=heads)

    # tile_m = tile_n = 128 -> 2x2 attention grid: exercises both the "parallel"
    # row axis and the column-chunk accumulation path at this small N.
    out = agdn_forward(layers, x, adj, tile_m=128, tile_n=128)
    out = jax.block_until_ready(out)

    assert out.shape == (N, out_ch), out.shape
    assert bool(jnp.all(jnp.isfinite(out)))

    ref = agdn_forward_ref(layers, x, adj)
    err = float(jnp.max(jnp.abs(out - ref)))
    scale = float(jnp.max(jnp.abs(ref))) + 1e-6
    assert err <= 0.1 * scale + 1e-2, (err, scale)   # bf16/approx-recip tolerance
    print("KERNEL_OK")
</pallas_src>

<mosaic_0001>
module attributes {stable_mosaic.version = 11 : i64} {
  func.func @_proj_kernel_res(%arg0: i32, %arg1: memref<128x128xf32, #tpu.memory_space<vmem>>, %arg2: memref<128x256xbf16, #tpu.memory_space<vmem>>, %arg3: memref<256x128xf32, #tpu.memory_space<vmem>>, %arg4: memref<128x256xbf16, #tpu.memory_space<vmem>>, %arg5: memref<1x256xf32, #tpu.memory_space<vmem>>, %arg6: memref<128x256xbf16, #tpu.memory_space<vmem>>, %arg7: memref<128x128xf32, #tpu.memory_space<vmem>>, %arg8: memref<128x256xf32, #tpu.memory_space<vmem>>) attributes {dimension_semantics = [#tpu.dimension_semantics<parallel>], iteration_bounds = array<i64: 2>, scalar_prefetch = 0 : i64, scratch_operands = 0 : i64, tpu.core_type = #tpu.core_type<tc>, window_params = [{transform_indices = @transform_0, window_bounds = array<i64: 128, 128>}, {pipeline_mode = #tpu.pipeline_mode<synchronous>, transform_indices = @transform_1, window_bounds = array<i64: 128, 256>}, {pipeline_mode = #tpu.pipeline_mode<synchronous>, transform_indices = @transform_2, window_bounds = array<i64: 256, 128>}, {pipeline_mode = #tpu.pipeline_mode<synchronous>, transform_indices = @transform_3, window_bounds = array<i64: 128, 256>}, {pipeline_mode = #tpu.pipeline_mode<synchronous>, transform_indices = @transform_4, window_bounds = array<i64: 1, 256>}, {transform_indices = @transform_5, window_bounds = array<i64: 128, 256>}, {transform_indices = @transform_6, window_bounds = array<i64: 128, 128>}, {transform_indices = @transform_7, window_bounds = array<i64: 128, 256>}]} {
    %c0 = arith.constant 0 : index
    %c0_0 = arith.constant 0 : index
    %0 = vector.load %arg1[%c0, %c0_0] : memref<128x128xf32, #tpu.memory_space<vmem>>, vector<128x128xf32>
    %1 = arith.truncf %0 : vector<128x128xf32> to vector<128x128xbf16>
    %c0_1 = arith.constant 0 : index
    %c0_2 = arith.constant 0 : index
    %2 = vector.load %arg2[%c0_1, %c0_2] : memref<128x256xbf16, #tpu.memory_space<vmem>>, vector<128x256xbf16>
    %cst = arith.constant dense<0.000000e+00> : vector<128x256xf32>
    %3 = tpu.matmul %1, %2, %cst {dimension_numbers = #tpu.dot_dimension_numbers<[1], [0], [0], [1], [0, 0, 1, 1], [], []>} : vector<128x128xbf16>, vector<128x256xbf16>, vector<128x256xf32> -> vector<128x256xf32>
    %c0_3 = arith.constant 0 : index
    %c0_4 = arith.constant 0 : index
    %4 = vector.load %arg3[%c0_3, %c0_4] : memref<256x128xf32, #tpu.memory_space<vmem>>, vector<256x128xf32>
    %cst_5 = arith.constant dense<0.000000e+00> : vector<128x128xf32>
    %5 = tpu.matmul %3, %4, %cst_5 {dimension_numbers = #tpu.dot_dimension_numbers<[1], [0], [0], [1], [0, 0, 1, 1], [], []>} : vector<128x256xf32>, vector<256x128xf32>, vector<128x128xf32> -> vector<128x128xf32>
    %c0_6 = arith.constant 0 : index
    %c0_7 = arith.constant 0 : index
    %6 = vector.load %arg7[%c0_6, %c0_7] : memref<128x128xf32, #tpu.memory_space<vmem>>, vector<128x128xf32>
    tpu.vector_store %arg7[%c0_6, %c0_7], %5 {strides = array<i32>} : memref<128x128xf32, #tpu.memory_space<vmem>>, vector<128x128xf32>,
    %c0_8 = arith.constant 0 : index
    %c0_9 = arith.constant 0 : index
    %7 = vector.load %arg4[%c0_8, %c0_9] : memref<128x256xbf16, #tpu.memory_space<vmem>>, vector<128x256xbf16>
    %cst_10 = arith.constant dense<0.000000e+00> : vector<128x256xf32>
    %8 = tpu.matmul %1, %7, %cst_10 {dimension_numbers = #tpu.dot_dimension_numbers<[1], [0], [0], [1], [0, 0, 1, 1], [], []>} : vector<128x128xbf16>, vector<128x256xbf16>, vector<128x256xf32> -> vector<128x256xf32>
    %c0_11 = arith.constant 0 : index
    %c0_12 = arith.constant 0 : index
    %9 = vector.load %arg5[%c0_11, %c0_12] : memref<1x256xf32, #tpu.memory_space<vmem>>, vector<1x256xf32>
    %10 = vector.broadcast %9 : vector<1x256xf32> to vector<128x256xf32>
    %11 = arith.addf %8, %10 : vector<128x256xf32>
    %c0_13 = arith.constant 0 : index
    %c0_14 = arith.constant 0 : index
    %12 = vector.load %arg8[%c0_13, %c0_14] : memref<128x256xf32, #tpu.memory_space<vmem>>, vector<128x256xf32>
    tpu.vector_store %arg8[%c0_13, %c0_14], %11 {strides = array<i32>} : memref<128x256xf32, #tpu.memory_space<vmem>>, vector<128x256xf32>,
    %13 = tpu.iota {dimensions = array<i32: 1>} : vector<128x256xi32>
    %c128_i32 = arith.constant 128 : i32
    %c0_i32 = arith.constant 0 : i32
    %14 = arith.cmpi eq, %c128_i32, %c0_i32 : i32
    %c1_i32 = arith.constant 1 : i32
    %15 = arith.select %14, %c1_i32, %c128_i32 : i32
    %16 = vector.broadcast %15 : i32 to vector<128x256xi32>
    %17 = arith.remsi %13, %16 : vector<128x256xi32>
    %c0_i32_15 = arith.constant 0 : i32
    %18 = vector.broadcast %c0_i32_15 : i32 to vector<128x256xi32>
    %19 = arith.cmpi ne, %17, %18 : vector<128x256xi32>
    %c0_i32_16 = arith.constant 0 : i32
    %20 = vector.broadcast %c0_i32_16 : i32 to vector<128x256xi32>
    %21 = arith.cmpi slt, %17, %20 : vector<128x256xi32>
    %c0_i32_17 = arith.constant 0 : i32
    %22 = arith.cmpi slt, %15, %c0_i32_17 : i32
    %23 = vector.broadcast %22 : i1 to vector<128x256xi1>
    %24 = vector.broadcast %23 : vector<128x256xi1> to vector<128x256xi1>
    %25 = arith.xori %21, %24 : vector<128x256xi1>
    %26 = arith.andi %25, %19 : vector<128x256xi1>
    %27 = vector.broadcast %15 : i32 to vector<128x256xi32>
    %28 = arith.addi %17, %27 : vector<128x256xi32>
    %29 = arith.select %26, %28, %17 : vector<128x256xi1>, vector<128x256xi32>
    %c16_i32 = arith.constant 16 : i32
    %30 = vector.broadcast %c16_i32 : i32 to vector<128x256xi32>
    %31 = arith.cmpi eq, %29, %30 : vector<128x256xi32>
    %cst_18 = arith.constant 1.000000e+00 : f32
    %32 = vector.broadcast %cst_18 : f32 to vector<128x256xf32>
    %33 = arith.select %31, %32, %3 : vector<128x256xi1>, vector<128x256xf32>
    %34 = arith.truncf %33 : vector<128x256xf32> to vector<128x256xbf16>
    %c0_19 = arith.constant 0 : index
    %c0_20 = arith.constant 0 : index
    %35 = vector.load %arg6[%c0_19, %c0_20] : memref<128x256xbf16, #tpu.memory_space<vmem>>, vector<128x256xbf16>
    tpu.vector_store %arg6[%c0_19, %c0_20], %34 {strides = array<i32>} : memref<128x256xbf16, #tpu.memory_space<vmem>>, vector<128x256xbf16>,
    return
  }
  func.func @transform_0(%arg0: i32) -> (i32, i32) {
    %c0_i32 = arith.constant 0 : i32
    %c0_i32_0 = arith.constant 0 : i32
    return %arg0, %c0_i32 : i32, i32
  }
  func.func @transform_1(%arg0: i32) -> (i32, i32) {
    %c0_i32 = arith.constant 0 : i32
    %c0_i32_0 = arith.constant 0 : i32
    %c0_i32_1 = arith.constant 0 : i32
    return %c0_i32, %c0_i32_0 : i32, i32
  }
  func.func @transform_2(%arg0: i32) -> (i32, i32) {
    %c0_i32 = arith.constant 0 : i32
    %c0_i32_0 = arith.constant 0 : i32
    %c0_i32_1 = arith.constant 0 : i32
    return %c0_i32, %c0_i32_0 : i32, i32
  }
  func.func @transform_3(%arg0: i32) -> (i32, i32) {
    %c0_i32 = arith.constant 0 : i32
    %c0_i32_0 = arith.constant 0 : i32
    %c0_i32_1 = arith.constant 0 : i32
    return %c0_i32, %c0_i32_0 : i32, i32
  }
  func.func @transform_4(%arg0: i32) -> (i32, i32) {
    %c0_i32 = arith.constant 0 : i32
    %c0_i32_0 = arith.constant 0 : i32
    %c0_i32_1 = arith.constant 0 : i32
    return %c0_i32, %c0_i32_0 : i32, i32
  }
  func.func @transform_5(%arg0: i32) -> (i32, i32) {
    %c0_i32 = arith.constant 0 : i32
    %c0_i32_0 = arith.constant 0 : i32
    return %arg0, %c0_i32 : i32, i32
  }
  func.func @transform_6(%arg0: i32) -> (i32, i32) {
    %c0_i32 = arith.constant 0 : i32
    %c0_i32_0 = arith.constant 0 : i32
    return %arg0, %c0_i32 : i32, i32
  }
  func.func @transform_7(%arg0: i32) -> (i32, i32) {
    %c0_i32 = arith.constant 0 : i32
    %c0_i32_0 = arith.constant 0 : i32
    return %arg0, %c0_i32 : i32, i32
  }
}

</mosaic_0001>

<bundles_post_ra>
// kernel: tpu_custom_call.1
= control target key start
LH: loop header
LB: loop body
LE: loop exit
PB: predicated region body
PF: predicated region fallthrough
CT: control target
= control target key end

     0   :  { %s2649_s0 = inlined_call_operand.hbm [shape: f32[256,128], index: 0, kind: input, shape index: {}]   ;;  %s2650_s1 = inlined_call_operand.hbm [shape: bf16[128,256], index: 1, kind: input, shape index: {}]   ;;  %s2651_s2 = inlined_call_operand.hbm [shape: f32[256,128], index: 2, kind: input, shape index: {}]   ;;  %s2652_s3 = inlined_call_operand.hbm [shape: bf16[128,256], index: 3, kind: input, shape index: {}]   ;;  %s2653_s4 = inlined_call_operand.vmem [shape: f32[1,256], index: 4, kind: input, shape index: {}]   ;;  %s2654_s5 = inlined_call_operand.hbm [shape: bf16[256,256], index: 5, kind: output, shape index: {0}]   ;;  %s2655_s6 = inlined_call_operand.hbm [shape: f32[256,128], index: 6, kind: output, shape index: {1}]   ;;  %s2656_s7 = inlined_call_operand.hbm [shape: f32[256,256], index: 7, kind: output, shape index: {2}]  }
   0x1   :  { %2665 = sst [smem:[#allocation19_spill]] %s2650_s1 }
   0x2   :  { %13 = vsyncpa [#allocation3], 0 }
   0x3   :  { %15 = vsyncpa [#allocation3 + $0x1], 0 }
   0x4   :  { %16 = vsyncpa [#allocation6], 0 }
   0x5   :  { %17 = vsyncpa [#allocation9], 0 }
   0x6   :  { %18 = vsyncpa [#allocation4], 0 }
   0x7   :  { %20 = vsyncpa [#allocation4 + $0x1], 0 }
   0x8   :  { %21 = vsyncpa [#allocation12], 0 }
   0x9   :  { %23 = vsyncpa [#allocation12 + $0x1], 0  ;;  %s2065_s24 = smov 0   ;;  %s2067_s25 = smov 0  }
   0xa   :  { %s2069_s26 = smov 0   ;;  %s2071_s27 = smov 0  }
   0xb LB: > { %s2086_s28 = sadd.s32 4294967295, %s2009_s27   ;;  %s2658_s29 = sadd.s32 4294967294, %s2009_s27   ;;  %s2009_s27 = sphi %s2071_s27, %s2691_s27   ;;  %s2005_s26 = sphi %s2069_s26, %s2690_s26   ;;  %s2001_s25 = sphi %s2067_s25, %s2689_s25   ;;  %s1997_s24 = sphi %s2065_s24, %s2688_s24  }
   0xc   : > { %p49_p0 = scmp.ne.s32.totalorder %s2001_s25, %s1997_s24  ;;  %p2657_p1 = scmp.eq.s32.totalorder %s2086_s28, 0 }
   0xd   : > { %p157_p2 = scmp.eq.s32.totalorder %s2086_s28, 1  ;;  %p163_p3 = scmp.eq.s32.totalorder %s2658_s29, 1 }
   0xe   : > { %p2097_p4 = por %p2657_p1, %p49_p0  ;;  %p1438_p5 = scmp.ge.s32.totalorder %s2009_s27, 1 }
   0xf   : > { %p2102_p6 = por %p163_p3, %p49_p0  ;;  %p222_p7 = scmp.lt.s32.totalorder %s2009_s27, 3 }
  0x10   : > { %s2666_s30 = scalar_select %p2097_p4, 1, 0 }
  0x11   : > { %s2667_s8 = scalar_select %p2102_p6, 1, 0 }
  0x12   : > { %p2107_p8 = pnand %p1438_p5, %p222_p7  ;;  %s2011_s10 = smov [#allocation5]  }
  0x13   : > { %s234_s11 = sshll.u32 %s2011_s10, 4  ;;  %s2012_s13 = smov [#allocation7]   ;;  %s235_s11 = int_to_ptr.vmem [resolvable:$true] %s234_s11 }
  0x14   : > { %s2668_s9 = scalar_select %p2107_p8, 1, 0 }
  0x15   : > { %p1653_p9 = pneg %p2107_p8  ;;  %s247_s14 = sshll.u32 %s2012_s13, 4  ;;  %s248_s14 = int_to_ptr.vmem [resolvable:$true] %s247_s14 }
  0x16   : > { %s2013_s15 = smov [#allocation8]   ;;  %s1786_s17 = scalar_lea.vmem %s235_s11, 2048 }
  0x17   : > { %p2116_p11 = pnand %p1653_p9, %p2657_p1  ;;  %s260_s16 = sshll.u32 %s2013_s15, 4  ;;  %s261_s16 = int_to_ptr.vmem [resolvable:$true] %s260_s16 }
  0x18   : > { %p1787_p13 = scmp.ne.s32.totalorder %s235_s11, %s1786_s17  ;;  %p1794_p5 = scmp.lt.s32.totalorder %s235_s11, %s235_s11 }
  0x19   : > { %p1777_p12 = pneg %p2116_p11  ;;  %p1795_p7 = scmp.lt.s32.totalorder %s1786_s17, %s1786_s17 }
  0x1b   : > { %p1789_p0 = pnand %p1787_p13, %p1777_p12  ;;  %p1796_p9 = por %p1795_p7, %p1794_p5 }
  0x1d   : > { %p1790_p3 = pneg %p1789_p0 }
  0x1f   : > { %p1797_p10 = pnand %p1796_p9, %p1790_p3 }
  0x21   : > { %1800 = shalt.err (!%p1797_p10)
}
  0x22   : > { %s2659_s18 = smov 128   ;;  %s2660_s19 = smov 8  }
  0x23   : > { %s2670_s1 = sld [smem:[#allocation19_spill]]  ;;  %s1812_s22 = scalar_lea.vmem %s248_s14, 4096 }
  0x24   : > { %p1813_p13 = scmp.ne.s32.totalorder %s248_s14, %s1812_s22  ;;  %p1820_p3 = scmp.lt.s32.totalorder %s248_s14, %s248_s14 }
  0x25   : > { %p1821_p10 = scmp.lt.s32.totalorder %s1812_s22, %s1812_s22 }
  0x26   : > { %p1815_p0 = pnand %p1813_p13, %p1777_p12 }
  0x27   : > { %p1822_p7 = por %p1821_p10, %p1820_p3 }
  0x28   : > { %p1816_p5 = pneg %p1815_p0 }
  0x29   : > { %1656 = dma.hbm_to_vmem [thread:$0]  (!%p2116_p11), %s2670_s1, 2048, %s235_s11, [#allocation6], %s2659_s18, %s2659_s18, %s2660_s19  }
  0x2a   : > { %p1823_p9 = pnand %p1822_p7, %p1816_p5 }
  0x2c   : > { %1826 = shalt.err (!%p1823_p9)
}
  0x2d   : > { %1659 = dma.hbm_to_vmem [thread:$0]  (!%p2116_p11), %s2651_s2, 4096, %s248_s14, [#allocation6], %s2659_s18, %s2659_s18, %s2660_s19  }
  0x2e   : > { %s1838_s11 = scalar_lea.vmem %s261_s16, 2048  ;;  %p1846_p3 = scmp.lt.s32.totalorder %s261_s16, %s261_s16 }
  0x2f   : > { %p1839_p1 = scmp.ne.s32.totalorder %s261_s16, %s1838_s11  ;;  %p1847_p5 = scmp.lt.s32.totalorder %s1838_s11, %s1838_s11 }
  0x31   : > { %p1841_p13 = pnand %p1839_p1, %p1777_p12  ;;  %p1848_p10 = por %p1847_p5, %p1846_p3 }
  0x33   : > { %p1842_p0 = pneg %p1841_p13 }
  0x35   : > { %p1849_p7 = pnand %p1848_p10, %p1842_p0 }
  0x37   : > { %1852 = shalt.err (!%p1849_p7)
}
  0x38   : > { %1662 = dma.hbm_to_vmem [thread:$0]  (!%p2116_p11), %s2652_s3, 2048, %s261_s16, [#allocation9], %s2659_s18, %s2659_s18, %s2660_s19  }
  0x39   : > { %s2156_s14 = sadd.s32 1, %s2009_s27   ;;  %s36_s17 = sadd.s32 1, %s2005_s26 }
  0x3a   : > { %s33_s12 = ssub.s32 %s2009_s27, %s2156_s14  ;;  %p43_p12 = scmp.ne.s32.totalorder %s2005_s26, %s2001_s25 }
  0x3b   : > { %p34_p1 = scmp.eq.s32.totalorder %s33_s12, 0  ;;  %p44_p9 = scmp.eq.s32.totalorder %s2009_s27, 0 }
  0x3c   : > { %p1680_p13 = scmp.lt.s32.totalorder %s2009_s27, 2  ;;  %p2170_p3 = por %p157_p2, %p43_p12 }
  0x3d   : > { %s2166_s20 = scalar_select %p34_p1, %s2005_s26, %s36_s17  }
  0x3e   : > { %p45_p0 = por %p44_p9, %p43_p12  ;;  %s277_s22 = sand.u32 1, %s2005_s26  }
  0x3f   : > { %s2671_s21 = scalar_select %p2170_p3, 1, 0 }
  0x40   : > { %s1515_s23 = sshll.u32 %s2009_s27, 11  ;;  %s1443_s16 = sshll.u32 %s277_s22, 7 }
  0x41   : > { %s2179_s13 = scalar_lea.hbm %s2649_s0, %s1515_s23  ;;  %s281_s15 = scalar_lea.vmem [#allocation2], %s1443_s16 }
  0x42   : > { %s288_s12 = sshll.u32 %s281_s15, 4  ;;  %p2181_p11 = pnand %p1680_p13, %p45_p0  ;;  %s2185_s12 = int_to_ptr.vmem [resolvable:$true] %s288_s12 }
  0x43   : > { %s2187_s29 = scalar_lea.sflag [#allocation3], %s277_s22  ;;  %s1853_s18 = scalar_lea.hbm %s2179_s13, 2048 }
  0x44   : > { %p1854_p2 = scmp.ne.s32.totalorder %s2179_s13, %s1853_s18  ;;  %p1855_p5 = pneg %p2181_p11 }
  0x45   : > { %s1858_s16 = scalar_lea.hbm %s2649_s0, 4096  ;;  %p1859_p1 = scmp.lt.s32.totalorder %s2179_s13, %s2649_s0 }
  0x46   : > { %p1856_p10 = pnand %p1855_p5, %p1854_p2  ;;  %p1860_p12 = scmp.lt.s32.totalorder %s1858_s16, %s1853_s18 }
  0x48   : > { %p1857_p7 = pneg %p1856_p10  ;;  %p1861_p9 = por %p1860_p12, %p1859_p1 }
  0x4a   : > { %p1862_p13 = pnand %p1861_p9, %p1857_p7 }
  0x4c   : > { %1865 = shalt.err (!%p1862_p13)
}
  0x4d   : > { %s1866_s22 = scalar_lea.vmem %s2185_s12, 2048  ;;  %s2016_s19 = smov [#allocation2]  }
  0x4e   : > { %p1867_p0 = scmp.ne.s32.totalorder %s2185_s12, %s1866_s22  ;;  %s1871_s1 = sshll.u32 %s2016_s19, 4  ;;  %s1872_s1 = int_to_ptr.vmem [resolvable:$false] %s1871_s1 }
  0x4f   : > { %s1873_s23 = scalar_lea.vmem %s1872_s1, 4096  ;;  %p1874_p10 = scmp.lt.s32.totalorder %s2185_s12, %s1872_s1 }
  0x50   : > { %p1869_p6 = pnand %p1867_p0, %p1855_p5  ;;  %p1875_p3 = scmp.lt.s32.totalorder %s1873_s23, %s1866_s22 }
  0x52   : > { %p1870_p2 = pneg %p1869_p6  ;;  %p1876_p4 = por %p1875_p3, %p1874_p10 }
  0x54   : > { %p1877_p8 = pnand %p1876_p4, %p1870_p2 }
  0x56   : > { %1880 = shalt.err (!%p1877_p8)
}
  0x57   : > { %s2673_s18 = smov 8   ;;  %s2674_s10 = smov 128  }
  0x58   : > { %1666 = dma.hbm_to_vmem [thread:$0]  (!%p2181_p11), %s2179_s13, 2048, %s2185_s12, %s2187_s29, %s2674_s10, %s2674_s10, %s2673_s18  }
  0x59   : > { %p2675_p6 = scmp.ne.s32.totalorder %s2668_s9, 0 }
  0x5a   : > { %s2214_s19 = sand.u32 (!%p2675_p6), 1, %s2001_s25   ;;  %p2676_p4 = scmp.ne.s32.totalorder (!%p2675_p6), %s2666_s30, 0 }
  0x5b   : > { %300 = sbr.rel (%p2675_p6) target bundleno = 626 (0x272), region = 40  ;;  %s2217_s1 = sshll.u32 (!%p2675_p6), %s2214_s19, 7 }
  0x5c   : > { %s303_s17 = scalar_lea.sflag (!%p2675_p6), [#allocation3], %s2214_s19  ;;  %s2221_s16 = scalar_lea.vmem (!%p2675_p6), [#allocation2], %s2217_s1 }
  0x60   : > { %1976 = dma.done.wait (%p2676_p4), %s303_s17, 2048  }
  0x61   : > { %1978 = vsyncadd (%p2676_p4), %s303_s17, 4294965248  ;;  %p2677_p8 = scmp.eq.s32.totalorder %s2086_s28, 0 }
  0x63   : > { %1980 = dma.done.wait (%p2677_p8), [#allocation6], 6144   ;;  %p2678_p3 = pmov %p2677_p8 }
  0x65   : > { %1982 = vsyncadd (%p2678_p3), [#allocation6], 4294961152  ;;  %p2679_p11 = pmov %p2678_p3 }
  0x66   : > { %p2680_p5 = pmov %p2678_p3 }
  0x67   : > { %1984 = dma.done.wait (%p2679_p11), [#allocation9], 2048  }
  0x68   : > { %1986 = vsyncadd (%p2680_p5), [#allocation9], 4294965248  ;;  %v2017_v0 = vmov 0   ;;  %v1727_v1 = vld [vmem:[#allocation5 + $0x74] ss:$8 sps:$4 sm:$0xff]   ;;  %v364_v17 = vld [vmem:[%s2221_s16] sm:$0xff] }
  0x69   : > { %516 = vmatprep.mubr.bf16.mxu0 %v2017_v0  ;;  %556 = vmatprep.mubr.bf16.mxu1 %v2017_v0  ;;  %v1729_v2 = vld [vmem:[#allocation5 + $0x70] ss:$8 sps:$4 sm:$0xff]   ;;  %v1730_v3 = vld [vmem:[#allocation5 + $0x64] ss:$8 sps:$4 sm:$0xff]   ;;  %v1732_v4 = vld [vmem:[#allocation5 + $0x60] ss:$8 sps:$4 sm:$0xff]  }
  0x6a   : > { %484 = vmatprep.subr.bf16.mxu0 %v1727_v1  ;;  %1617 = vmatprep.subr.bf16.mxu1 %v1727_v1  ;;  %v1733_v5 = vld [vmem:[#allocation5 + $0x54] ss:$8 sps:$4 sm:$0xff]   ;;  %v1735_v6 = vld [vmem:[#allocation5 + $0x50] ss:$8 sps:$4 sm:$0xff]   ;;  %v1736_v7 = vld [vmem:[#allocation5 + $0x44] ss:$8 sps:$4 sm:$0xff]  }
  0x6b   : > { %485 = vmatpush1.bf16.msra.mxu0 %v1729_v2  ;;  %1625 = vmatpush1.bf16.msra.mxu1 %v1729_v2  ;;  %v1738_v8 = vld [vmem:[#allocation5 + $0x40] ss:$8 sps:$4 sm:$0xff]   ;;  %v1739_v9 = vld [vmem:[#allocation5 + $0x34] ss:$8 sps:$4 sm:$0xff]   ;;  %v1741_v10 = vld [vmem:[#allocation5 + $0x30] ss:$8 sps:$4 sm:$0xff]  }
  0x6c   : > { %486 = vmatprep.subr.bf16.mxu0 %v1730_v3  ;;  %1618 = vmatprep.subr.bf16.mxu1 %v1730_v3  ;;  %v1742_v11 = vld [vmem:[#allocation5 + $0x24] ss:$8 sps:$4 sm:$0xff]   ;;  %v1744_v12 = vld [vmem:[#allocation5 + $0x20] ss:$8 sps:$4 sm:$0xff]   ;;  %v1745_v13 = vld [vmem:[#allocation5 + $0x14] ss:$8 sps:$4 sm:$0xff]  }
  0x6d   : > { %v1747_v14 = vld [vmem:[#allocation5 + $0x10] ss:$8 sps:$4 sm:$0xff]   ;;  %v1748_v15 = vld [vmem:[#allocation5 + $0x4] ss:$8 sps:$4 sm:$0xff]   ;;  %v1750_v16 = vld [vmem:[#allocation5] ss:$8 sps:$4 sm:$0xff]  }
  0x6e   : > { %v365_v18 = vld [vmem:[%s2221_s16 + $0x8] sm:$0xff]  ;;  %v372_v19 = vld [vmem:[%s2221_s16 + $0x40] sm:$0xff]  ;;  %v1753_v21 = vld [vmem:[#allocation8 + $0x74] ss:$8 sps:$4 sm:$0xff]   ;;  %s2320_s29 = scalar_lea.vmem [#allocation10], %s2217_s1  ;;  %s1453_s13 = sshll.u32 %s2214_s19, 8 }
  0x6f   : > { %487 = vmatpush1.bf16.msra.mxu0 %v1732_v4  ;;  %1626 = vmatpush1.bf16.msra.mxu1 %v1732_v4  ;;  %v373_v20 = vld [vmem:[%s2221_s16 + $0x48] sm:$0xff]  ;;  %v628_v22 = vld [vmem:[#allocation7 + $0xf8] sm:$0xff]  ;;  %v2241_v23 = vpack.c.bf16 %v365_v18, %v364_v17  ;;  %v366_v26 = vld [vmem:[%s2221_s16 + $0x10] sm:$0xff]  ;;  %s2431_s12 = scalar_lea.vmem [#allocation13], %s1453_s13  ;;  %s2664_s11 = sshll.u32 %s2086_s28, 11 }
  0x70   : > { %488 = vmatprep.subr.bf16.mxu0 %v1733_v5  ;;  %1619 = vmatprep.subr.bf16.mxu1 %v1733_v5  ;;  %v2243_v24 = vpack.c.bf16 %v373_v20, %v372_v19  ;;  %v1751_v25 = vld [vmem:[#allocation8 + $0x70] ss:$8 sps:$4 sm:$0xff]   ;;  %v1756_v27 = vld [vmem:[#allocation8 + $0x64] ss:$8 sps:$4 sm:$0xff]   ;;  %v1754_v34 = vld [vmem:[#allocation8 + $0x60] ss:$8 sps:$4 sm:$0xff]   ;;  %s2512_s23 = scalar_lea.hbm %s2654_s5, %s2664_s11 }
  0x71   : > { %v612_v28 = vld [vmem:[#allocation7 + $0x78] sm:$0xff]  ;;  %v627_v30 = vld [vmem:[#allocation7 + $0xf0] sm:$0xff]  ;;  %v626_v35 = vld [vmem:[#allocation7 + $0xe8] sm:$0xff]  ;;  %s1241_s18 = sshll.u32 %s2320_s29, 4  ;;  %s1217_s10 = scalar_lea.sflag [#allocation4], %s2214_s19  ;;  %s2515_s18 = int_to_ptr.vmem [resolvable:$true] %s1241_s18 }
  0x72   : > { %v367_v29 = vld [vmem:[%s2221_s16 + $0x18] sm:$0xff]  ;;  %v374_v31 = vld [vmem:[%s2221_s16 + $0x50] sm:$0xff]  ;;  %v610_v37 = vld [vmem:[#allocation7 + $0x68] sm:$0xff]  ;;  %s1881_s17 = scalar_lea.vmem %s2515_s18, 2048  ;;  %p2683_p1 = scmp.ne.s32.totalorder %s2671_s21, 0 }
  0x73   : > { %489 = vmatpush1.bf16.msra.mxu0 %v1735_v6  ;;  %1627 = vmatpush1.bf16.msra.mxu1 %v1735_v6  ;;  %v375_v32 = vld [vmem:[%s2221_s16 + $0x58] sm:$0xff]  ;;  %v611_v33 = vld [vmem:[#allocation7 + $0x70] sm:$0xff]  ;;  %v2253_v38 = vpack.c.bf16 %v367_v29, %v366_v26  ;;  %v625_v40 = vld [vmem:[#allocation7 + $0xe0] sm:$0xff]  ;;  %p1882_p7 = scmp.ne.s32.totalorder %s2515_s18, %s1881_s17 }
  0x74   : > { %490 = vmatprep.subr.bf16.mxu0 %v1736_v7  ;;  %1620 = vmatprep.subr.bf16.mxu1 %v1736_v7  ;;  %v1759_v36 = vld [vmem:[#allocation8 + $0x54] ss:$8 sps:$4 sm:$0xff]   ;;  %v2255_v39 = vpack.c.bf16 %v375_v32, %v374_v31  ;;  %v1757_v41 = vld [vmem:[#allocation8 + $0x50] ss:$8 sps:$4 sm:$0xff]   ;;  %v609_v42 = vld [vmem:[#allocation7 + $0x60] sm:$0xff] }
  0x75   : > { %v1762_v43 = vld [vmem:[#allocation8 + $0x44] ss:$8 sps:$4 sm:$0xff]   ;;  %v624_v46 = vld [vmem:[#allocation7 + $0xd8] sm:$0xff]  ;;  %v1760_v50 = vld [vmem:[#allocation8 + $0x40] ss:$8 sps:$4 sm:$0xff]   ;;  %p1883_p12 = pnand %p1882_p7, %p2683_p1 }
  0x76   : > { %v368_v44 = vld [vmem:[%s2221_s16 + $0x20] sm:$0xff]  ;;  %v369_v45 = vld [vmem:[%s2221_s16 + $0x28] sm:$0xff]  ;;  %v608_v49 = vld [vmem:[#allocation7 + $0x58] sm:$0xff] }
  0x77   : > { %491 = vmatpush1.bf16.msra.mxu0 %v1738_v8  ;;  %1628 = vmatpush1.bf16.msra.mxu1 %v1738_v8  ;;  %v376_v47 = vld [vmem:[%s2221_s16 + $0x60] sm:$0xff]  ;;  %v377_v48 = vld [vmem:[%s2221_s16 + $0x68] sm:$0xff]  ;;  %v623_v51 = vld [vmem:[#allocation7 + $0xd0] sm:$0xff]  ;;  %v2265_v54 = vpack.c.bf16 %v369_v45, %v368_v44  ;;  %p1884_p9 = pneg %p1883_p12 }
  0x78   : > { %492 = vmatprep.subr.bf16.mxu0 %v1739_v9  ;;  %1621 = vmatprep.subr.bf16.mxu1 %v1739_v9  ;;  %v607_v52 = vld [vmem:[#allocation7 + $0x50] sm:$0xff]  ;;  %v2267_v55 = vpack.c.bf16 %v377_v48, %v376_v47  ;;  %v622_v56 = vld [vmem:[#allocation7 + $0xc8] sm:$0xff]  ;;  %v371_v61 = vld [vmem:[%s2221_s16 + $0x38] sm:$0xff] }
  0x79   : > { %v1765_v53 = vld [vmem:[#allocation8 + $0x34] ss:$8 sps:$4 sm:$0xff]   ;;  %v1763_v57 = vld [vmem:[#allocation8 + $0x30] ss:$8 sps:$4 sm:$0xff]   ;;  %v606_v58 = vld [vmem:[#allocation7 + $0x48] sm:$0xff] }
  0x7a   : > { %v1768_v59 = vld [vmem:[#allocation8 + $0x24] ss:$8 sps:$4 sm:$0xff]   ;;  %v370_v60 = vld [vmem:[%s2221_s16 + $0x30] sm:$0xff]  ;;  %v379_v1 = vld [vmem:[%s2221_s16 + $0x78] sm:$0xff] }
  0x7b   : > { %493 = vmatpush1.bf16.msra.mxu0 %v1741_v10  ;;  %1629 = vmatpush1.bf16.msra.mxu1 %v1741_v10  ;;  %v621_v62 = vld [vmem:[#allocation7 + $0xc0] sm:$0xff]  ;;  %v378_v63 = vld [vmem:[%s2221_s16 + $0x70] sm:$0xff]  ;;  %v620_v3 = vld [vmem:[#allocation7 + $0xb8] sm:$0xff]  ;;  %v383_v7 = vpack.c.bf16 %v371_v61, %v370_v60  ;;  %s2018_s16 = smov [#allocation10]  }
  0x7c   : > { %494 = vmatprep.subr.bf16.mxu0 %v1742_v11  ;;  %1622 = vmatprep.subr.bf16.mxu1 %v1742_v11  ;;  %v605_v2 = vld [vmem:[#allocation7 + $0x40] sm:$0xff]  ;;  %v604_v5 = vld [vmem:[#allocation7 + $0x38] sm:$0xff]  ;;  %v387_v8 = vpack.c.bf16 %v379_v1, %v378_v63  ;;  %v619_v9 = vld [vmem:[#allocation7 + $0xb0] sm:$0xff]  ;;  %s1885_s30 = sshll.u32 %s2018_s16, 4  ;;  %s1886_s30 = int_to_ptr.vmem [resolvable:$false] %s1885_s30 }
  0x7d   : > { %v1766_v4 = vld [vmem:[#allocation8 + $0x20] ss:$8 sps:$4 sm:$0xff]   ;;  %v1771_v6 = vld [vmem:[#allocation8 + $0x14] ss:$8 sps:$4 sm:$0xff]   ;;  %v1769_v11 = vld [vmem:[#allocation8 + $0x10] ss:$8 sps:$4 sm:$0xff]   ;;  %p1888_p13 = scmp.lt.s32.totalorder %s2515_s18, %s1886_s30 }
  0x7e   : > { %v603_v10 = vld [vmem:[#allocation7 + $0x30] sm:$0xff]  ;;  %v1772_v17 = vld [vmem:[#allocation8] ss:$8 sps:$4 sm:$0xff]   ;;  %v616_v18 = vld [vmem:[#allocation7 + $0x98] sm:$0xff]  ;;  %s1887_s9 = scalar_lea.vmem %s1886_s30, 4096 }
  0x7f   : > { %495 = vmatpush1.bf16.msra.mxu0 %v1744_v12  ;;  %1630 = vmatpush1.bf16.msra.mxu1 %v1744_v12  ;;  %v618_v12 = vld [vmem:[#allocation7 + $0xa8] sm:$0xff]  ;;  %v600_v19 = vld [vmem:[#allocation7 + $0x18] sm:$0xff]  ;;  %v615_v20 = vld [vmem:[#allocation7 + $0x90] sm:$0xff]  ;;  %p1889_p0 = scmp.lt.s32.totalorder %s1887_s9, %s1881_s17 }
  0x80   : > { %496 = vmatprep.subr.bf16.mxu0 %v1745_v13  ;;  %1623 = vmatprep.subr.bf16.mxu1 %v1745_v13  ;;  %v1774_v13 = vld [vmem:[#allocation8 + $0x4] ss:$8 sps:$4 sm:$0xff]  }
  0x81   : > { %v613_v26 = vld [vmem:[#allocation7 + $0x80] sm:$0xff]  ;;  %p1890_p2 = por %p1889_p0, %p1888_p13 }
  0x83   : > { %497 = vmatpush1.bf16.msra.mxu0 %v1747_v14  ;;  %1631 = vmatpush1.bf16.msra.mxu1 %v1747_v14  ;;  %v602_v14 = vld [vmem:[#allocation7 + $0x28] sm:$0xff]  ;;  %p1891_p10 = pnand %p1890_p2, %p1884_p9 }
  0x84   : > { %498 = vmatprep.subr.bf16.mxu0 %v1748_v15  ;;  %1624 = vmatprep.subr.bf16.mxu1 %v1748_v15  ;;  %v617_v15 = vld [vmem:[#allocation7 + $0xa0] sm:$0xff] }
  0x87   : > { %499 = vmatpush1.bf16.msra.mxu0 %v1750_v16  ;;  %1632 = vmatpush1.bf16.msra.mxu1 %v1750_v16  ;;  %v601_v16 = vld [vmem:[#allocation7 + $0x20] sm:$0xff] }
  0x88   : > { %898 = vmatprep.subr.bf16.mxu0 %v1753_v21  ;;  %1537 = vmatprep.subr.mxu1 %v628_v22  ;;  %v599_v21 = vld [vmem:[#allocation7 + $0x10] sm:$0xff]  ;;  %v614_v22 = vld [vmem:[#allocation7 + $0x88] sm:$0xff] }
  0x8a   : > { %517 = vmatmul.mubr.bf16.vlgmr.msra.gmra.mxu0 %v2241_v23  ;;  %557 = vmatmul.mubr.bf16.vlgmr.msra.gmra.mxu1 %v2243_v24 }
  0x8b   : > { %526 = vmatprep.mubr.bf16.mxu0 %v2017_v0  ;;  %566 = vmatprep.mubr.bf16.mxu1 %v2017_v0 }
  0x8c   : > { %899 = vmatpush1.bf16.msra.mxu0 %v1751_v25  ;;  %1538 = vmatpush3.msra.mxu1 %v612_v28  ;;  %v598_v25 = vld [vmem:[#allocation7 + $0x8] sm:$0xff] }
  0x8d   : > { %900 = vmatprep.subr.bf16.mxu0 %v1756_v27  ;;  %1539 = vmatprep.subr.mxu1 %v627_v30  ;;  %v808_v27 = vlaneseq }
  0x8e   : > { %1540 = vmatpush3.msra.mxu1 %v611_v33 }
  0x8f   : > { %1541 = vmatprep.subr.mxu1 %v626_v35  ;;  %v2292_v28 = vand.u32 127, %v808_v27 }
  0x90   : > { %901 = vmatpush1.bf16.msra.mxu0 %v1754_v34  ;;  %1542 = vmatpush3.msra.mxu1 %v610_v37 }
  0x91   : > { %902 = vmatprep.subr.bf16.mxu0 %v1759_v36  ;;  %1543 = vmatprep.subr.mxu1 %v625_v40  ;;  %vm1070_vm0 = vcmp.eq.s32.totalorder %v2292_v28, 16 }
  0x92   : > { %527 = vmatmul.mubr.bf16.gmra.mxu0 %v2253_v38  ;;  %567 = vmatmul.mubr.bf16.gmra.mxu1 %v2255_v39 }
  0x93   : > { %536 = vmatprep.mubr.bf16.mxu0 %v2017_v0  ;;  %576 = vmatprep.mubr.bf16.mxu1 %v2017_v0 }
  0x94   : > { %903 = vmatpush1.bf16.msra.mxu0 %v1757_v41  ;;  %1544 = vmatpush3.msra.mxu1 %v609_v42 }
  0x95   : > { %1545 = vmatprep.subr.mxu1 %v624_v46  ;;  %904 = vmatprep.subr.bf16.mxu0 %v1762_v43 }
  0x96   : > { %1546 = vmatpush3.msra.mxu1 %v608_v49 }
  0x97   : > { %1547 = vmatprep.subr.mxu1 %v623_v51 }
  0x98   : > { %905 = vmatpush1.bf16.msra.mxu0 %v1760_v50  ;;  %1548 = vmatpush3.msra.mxu1 %v607_v52 }
  0x99   : > { %1549 = vmatprep.subr.mxu1 %v622_v56  ;;  %906 = vmatprep.subr.bf16.mxu0 %v1765_v53 }
  0x9a   : > { %537 = vmatmul.mubr.bf16.gmra.mxu0 %v2265_v54  ;;  %577 = vmatmul.mubr.bf16.gmra.mxu1 %v2267_v55 }
  0x9b   : > { %546 = vmatprep.mubr.bf16.mxu0 %v2017_v0  ;;  %586 = vmatprep.mubr.bf16.mxu1 %v2017_v0 }
  0x9c   : > { %1550 = vmatpush3.msra.mxu1 %v606_v58  ;;  %907 = vmatpush1.bf16.msra.mxu0 %v1763_v57 }
  0x9d   : > { %1551 = vmatprep.subr.mxu1 %v621_v62  ;;  %908 = vmatprep.subr.bf16.mxu0 %v1768_v59 }
  0x9e   : > { %1552 = vmatpush3.msra.mxu1 %v605_v2 }
  0x9f   : > { %1553 = vmatprep.subr.mxu1 %v620_v3 }
  0xa0   : > { %1554 = vmatpush3.msra.mxu1 %v604_v5  ;;  %909 = vmatpush1.bf16.msra.mxu0 %v1766_v4 }
  0xa1   : > { %1555 = vmatprep.subr.mxu1 %v619_v9  ;;  %910 = vmatprep.subr.bf16.mxu0 %v1771_v6 }
  0xa2   : > { %547 = vmatmul.mubr.bf16.gmra.mxu0 %v383_v7  ;;  %587 = vmatmul.mubr.bf16.gmra.mxu1 %v387_v8 }
  0xa3   : > { %1556 = vmatpush3.msra.mxu1 %v603_v10  ;;  %930 = vmatprep.mubr.bf16.mxu0 %v2017_v0 }
  0xa4   : > { %1557 = vmatprep.subr.mxu1 %v618_v12  ;;  %911 = vmatpush1.bf16.msra.mxu0 %v1769_v11 }
  0xa5   : > { %1558 = vmatpush3.msra.mxu1 %v602_v14  ;;  %912 = vmatprep.subr.bf16.mxu0 %v1774_v13 }
  0xa6   : > { %1559 = vmatprep.subr.mxu1 %v617_v15 }
  0xa7   : > { %1560 = vmatpush3.msra.mxu1 %v601_v16 }
  0xa8   : > { %1561 = vmatprep.subr.mxu1 %v616_v18  ;;  %913 = vmatpush1.bf16.msra.mxu0 %v1772_v17 }
  0xa9   : > { %1562 = vmatpush3.msra.mxu1 %v600_v19 }
  0xaa   : > { %1563 = vmatprep.subr.mxu1 %v615_v20 }
  0xab   : > { %1564 = vmatpush3.msra.mxu1 %v599_v21  ;;  %931 = vmatmul.mubr.bf16.vlgmr.msra.gmra.mxu0 %v2241_v23  ;;  %v597_v23 = vld [vmem:[#allocation7] sm:$0xff] }
  0xac   : > { %1565 = vmatprep.subr.mxu1 %v614_v22  ;;  %940 = vmatprep.mubr.bf16.mxu0 %v2017_v0  ;;  %v809_v22 = vshrl.u32 %v808_v27, 7 }
  0xad   : > { %1566 = vmatpush3.msra.mxu1 %v598_v25 }
  0xae   : > { %1567 = vmatprep.subr.mxu1 %v613_v26 }
  0xaf   : > { %1568 = vmatpush3.msra.mxu1 %v597_v23 }
  0xb3   : > { %941 = vmatmul.mubr.bf16.gmra.mxu0 %v2253_v38 }
  0xb4   : > { %950 = vmatprep.mubr.bf16.mxu0 %v2017_v0 }
  0xbb   : > { %951 = vmatmul.mubr.bf16.gmra.mxu0 %v2265_v54 }
  0xbc   : > { %960 = vmatprep.mubr.bf16.mxu0 %v2017_v0 }
  0xc3   : > { %961 = vmatmul.mubr.bf16.gmra.mxu0 %v383_v7 }
  0xc4   : > { %970 = vmatprep.mubr.bf16.mxu0 %v2017_v0 }
  0xcb   : > { %971 = vmatmul.mubr.bf16.gmra.mxu0 %v2243_v24  ;;  %v1045_v24 = vadd.s32 128, %v2292_v28 }
  0xcc   : > { %980 = vmatprep.mubr.bf16.mxu0 %v2017_v0 }
  0xcd   : > { %v1057_v29 = vand.u32 127, %v1045_v24 }
  0xcf   : > { %vm2296_vm1 = vcmp.eq.s32.totalorder %v1057_v29, 16 }
  0xd3   : > { %981 = vmatmul.mubr.bf16.gmra.mxu0 %v2255_v39 }
  0xd4   : > { %990 = vmatprep.mubr.bf16.mxu0 %v2017_v0 }
  0xdb   : > { %991 = vmatmul.mubr.bf16.gmra.mxu0 %v2267_v55 }
  0xdc   : > { %1000 = vmatprep.mubr.bf16.mxu0 %v2017_v0 }
  0xe3   : > { %1001 = vmatmul.mubr.bf16.gmra.mxu0 %v387_v8 }
 0x14a   : > { %v518_v30 = vpop.f32.mrf.mxu0  ;;  %v2300_v32 = vpop.f32.mrf.mxu1 }
 0x14b   : > { %v1088_v0 = vsel %vm1070_vm0, 1.0, %v2300_v32  ;;  %v1072_v35 = vsel %vm1070_vm0, 1.0, %v518_v30 }
 0x14c   : > { %v520_v33 = vpop.f32.mrf.mxu0  ;;  %v2305_v34 = vpop.f32.mrf.mxu1 }
 0x14d   : > { %v1073_v36 = vsel %vm2296_vm1, 1.0, %v520_v33  ;;  %693 = vmatprep.mubr.f32.mxu1 %v520_v33  ;;  %v1089_v37 = vsel %vm2296_vm1, 1.0, %v2305_v34 }
 0x14e   : > { %v1516_v38 = vpack.c.bf16 %v1073_v36, %v1072_v35  ;;  %v522_v39 = vpop.f32.mrf.mxu0  ;;  %694 = vmatmul.mubr.f32.vlgmr.msra.gmra.mxu1 %v518_v30  ;;  %v1524_v40 = vpack.c.bf16 %v1089_v37, %v1088_v0  ;;  %v2314_v41 = vpop.f32.mrf.mxu1  ;;  %v810_v36 = vsub.s32 0, %v809_v22 }
 0x14f   : > { %v1090_v42 = vsel %vm1070_vm0, 1.0, %v2314_v41  ;;  %v1074_v45 = vsel %vm1070_vm0, 1.0, %v522_v39 }
 0x150   : > { %1200 = vst [vmem:[%s2320_s29] sm:$0xff] %v1516_v38  ;;  %v524_v43 = vpop.f32.mrf.mxu0  ;;  %1208 = vst [vmem:[%s2320_s29 + $0x40] sm:$0xff] %v1524_v40  ;;  %v2324_v44 = vpop.f32.mrf.mxu1  ;;  %v806_v40 = vld [vmem:[%s2653_s4] sm:$0x3] }
 0x151   : > { %v1075_v46 = vsel %vm2296_vm1, 1.0, %v524_v43  ;;  %698 = vmatprep.mubr.f32.mxu1 %v524_v43  ;;  %v1091_v47 = vsel %vm2296_vm1, 1.0, %v2324_v44 }
 0x152   : > { %v1517_v48 = vpack.c.bf16 %v1075_v46, %v1074_v45  ;;  %v528_v49 = vpop.f32.mrf.mxu0  ;;  %699 = vmatmul.mubr.f32.gmra.mxu1 %v522_v39  ;;  %v1525_v50 = vpack.c.bf16 %v1091_v47, %v1090_v42  ;;  %v2333_v51 = vpop.f32.mrf.mxu1  ;;  %v814_v47 = vsub.s32 1, %v809_v22 }
 0x153   : > { %v1092_v52 = vsel %vm1070_vm0, 1.0, %v2333_v51  ;;  %v1076_v55 = vsel %vm1070_vm0, 1.0, %v528_v49 }
 0x154   : > { %1201 = vst [vmem:[%s2320_s29 + $0x8] sm:$0xff] %v1517_v48  ;;  %v530_v53 = vpop.f32.mrf.mxu0  ;;  %1209 = vst [vmem:[%s2320_s29 + $0x48] sm:$0xff] %v1525_v50  ;;  %v2340_v54 = vpop.f32.mrf.mxu1 }
 0x155   : > { %v1077_v56 = vsel %vm2296_vm1, 1.0, %v530_v53  ;;  %703 = vmatprep.mubr.f32.mxu1 %v530_v53  ;;  %v1093_v57 = vsel %vm2296_vm1, 1.0, %v2340_v54 }
 0x156   : > { %v1518_v58 = vpack.c.bf16 %v1077_v56, %v1076_v55  ;;  %v532_v59 = vpop.f32.mrf.mxu0  ;;  %704 = vmatmul.mubr.f32.gmra.mxu1 %v528_v49  ;;  %v1526_v60 = vpack.c.bf16 %v1093_v57, %v1092_v52  ;;  %v2349_v61 = vpop.f32.mrf.mxu1  ;;  %v2416_v52 = vrot.slane %v806_v40, %v810_v36 }
 0x157   : > { %v1094_v62 = vsel %vm1070_vm0, 1.0, %v2349_v61  ;;  %v1078_v2 = vsel %vm1070_vm0, 1.0, %v532_v59 }
 0x158   : > { %1202 = vst [vmem:[%s2320_s29 + $0x10] sm:$0xff] %v1518_v58  ;;  %v534_v63 = vpop.f32.mrf.mxu0  ;;  %1210 = vst [vmem:[%s2320_s29 + $0x50] sm:$0xff] %v1526_v60  ;;  %v2356_v1 = vpop.f32.mrf.mxu1 }
 0x159   : > { %v1079_v3 = vsel %vm2296_vm1, 1.0, %v534_v63  ;;  %708 = vmatprep.mubr.f32.mxu1 %v534_v63  ;;  %v1095_v4 = vsel %vm2296_vm1, 1.0, %v2356_v1 }
 0x15a   : > { %v1519_v5 = vpack.c.bf16 %v1079_v3, %v1078_v2  ;;  %v538_v6 = vpop.f32.mrf.mxu0  ;;  %709 = vmatmul.mubr.f32.gmra.mxu1 %v532_v59  ;;  %v1527_v7 = vpack.c.bf16 %v1095_v4, %v1094_v62  ;;  %v2365_v8 = vpop.f32.mrf.mxu1  ;;  %v2424_v59 = vrot.slane %v806_v40, %v814_v47 }
 0x15b   : > { %v1096_v9 = vsel %vm1070_vm0, 1.0, %v2365_v8  ;;  %v1080_v12 = vsel %vm1070_vm0, 1.0, %v538_v6 }
 0x15c   : > { %1203 = vst [vmem:[%s2320_s29 + $0x18] sm:$0xff] %v1519_v5  ;;  %v540_v10 = vpop.f32.mrf.mxu0  ;;  %1211 = vst [vmem:[%s2320_s29 + $0x58] sm:$0xff] %v1527_v7  ;;  %v2372_v11 = vpop.f32.mrf.mxu1 }
 0x15d   : > { %v1081_v13 = vsel %vm2296_vm1, 1.0, %v540_v10  ;;  %713 = vmatprep.mubr.f32.mxu1 %v540_v10  ;;  %v1097_v14 = vsel %vm2296_vm1, 1.0, %v2372_v11 }
 0x15e   : > { %v1520_v15 = vpack.c.bf16 %v1081_v13, %v1080_v12  ;;  %v542_v16 = vpop.f32.mrf.mxu0  ;;  %714 = vmatmul.mubr.f32.gmra.mxu1 %v538_v6  ;;  %v1528_v17 = vpack.c.bf16 %v1097_v14, %v1096_v9  ;;  %v2381_v18 = vpop.f32.mrf.mxu1 }
 0x15f   : > { %v1098_v19 = vsel %vm1070_vm0, 1.0, %v2381_v18  ;;  %v1082_v25 = vsel %vm1070_vm0, 1.0, %v542_v16 }
 0x160   : > { %1204 = vst [vmem:[%s2320_s29 + $0x20] sm:$0xff] %v1520_v15  ;;  %v544_v20 = vpop.f32.mrf.mxu0  ;;  %1212 = vst [vmem:[%s2320_s29 + $0x60] sm:$0xff] %v1528_v17  ;;  %v2388_v21 = vpop.f32.mrf.mxu1 }
 0x161   : > { %v1083_v26 = vsel %vm2296_vm1, 1.0, %v544_v20  ;;  %718 = vmatprep.mubr.f32.mxu1 %v544_v20  ;;  %v1099_v23 = vsel %vm2296_vm1, 1.0, %v2388_v21 }
 0x162   : > { %v1521_v24 = vpack.c.bf16 %v1083_v26, %v1082_v25  ;;  %v548_v29 = vpop.f32.mrf.mxu0  ;;  %719 = vmatmul.mubr.f32.gmra.mxu1 %v542_v16  ;;  %v1529_v30 = vpack.c.bf16 %v1099_v23, %v1098_v19  ;;  %v588_v0 = vpop.f32.mrf.mxu1 }
 0x163   : > { %v1100_v33 = vsel %vm1070_vm0, 1.0, %v588_v0  ;;  %v1084_v37 = vsel %vm1070_vm0, 1.0, %v548_v29 }
 0x164   : > { %1205 = vst [vmem:[%s2320_s29 + $0x28] sm:$0xff] %v1521_v24  ;;  %v550_v27 = vpop.f32.mrf.mxu0  ;;  %1213 = vst [vmem:[%s2320_s29 + $0x68] sm:$0xff] %v1529_v30  ;;  %v590_v35 = vpop.f32.mrf.mxu1 }
 0x165   : > { %v1085_v38 = vsel %vm2296_vm1, 1.0, %v550_v27  ;;  %723 = vmatprep.mubr.f32.mxu1 %v550_v27  ;;  %v1101_v39 = vsel %vm2296_vm1, 1.0, %v590_v35 }
 0x166   : > { %v1522_v42 = vpack.c.bf16 %v1085_v38, %v1084_v37  ;;  %v552_v43 = vpop.f32.mrf.mxu0  ;;  %724 = vmatmul.mubr.f32.gmra.mxu1 %v548_v29  ;;  %v1530_v45 = vpack.c.bf16 %v1101_v39, %v1100_v33  ;;  %v592_v46 = vpop.f32.mrf.mxu1 }
 0x167   : > { %v1102_v48 = vsel %vm1070_vm0, 1.0, %v592_v46  ;;  %v1086_v53 = vsel %vm1070_vm0, 1.0, %v552_v43 }
 0x168   : > { %1206 = vst [vmem:[%s2320_s29 + $0x30] sm:$0xff] %v1522_v42  ;;  %v554_v49 = vpop.f32.mrf.mxu0  ;;  %1214 = vst [vmem:[%s2320_s29 + $0x70] sm:$0xff] %v1530_v45  ;;  %v594_v50 = vpop.f32.mrf.mxu1 }
 0x169   : > { %v1087_v55 = vsel %vm2296_vm1, 1.0, %v554_v49  ;;  %728 = vmatprep.mubr.f32.mxu1 %v554_v49  ;;  %v1103_v56 = vsel %vm2296_vm1, 1.0, %v594_v50 }
 0x16a   : > { %v1523_v57 = vpack.c.bf16 %v1087_v55, %v1086_v53  ;;  %729 = vmatmul.mubr.f32.gmra.mxu1 %v552_v43  ;;  %v1531_v58 = vpack.c.bf16 %v1103_v56, %v1102_v48 }
 0x16b   : > { %733 = vmatprep.mubr.f32.mxu1 %v2305_v34  ;;  %v932_v60 = vpop.f32.mrf.mxu0 }
 0x16c   : > { %1207 = vst [vmem:[%s2320_s29 + $0x38] sm:$0xff] %v1523_v57  ;;  %1215 = vst [vmem:[%s2320_s29 + $0x78] sm:$0xff] %v1531_v58  ;;  %v933_v28 = vadd.f32 %v932_v60, %v2416_v52 }
 0x16d   : > { %v934_v62 = vpop.f32.mrf.mxu0 }
 0x16e   : > { %734 = vmatmul.mubr.f32.gmra.mxu1 %v2300_v32  ;;  %1011 = vst [vmem:[%s2431_s12] sm:$0xff] %v933_v28  ;;  %v935_v31 = vadd.f32 %v934_v62, %v2424_v59 }
 0x16f   : > { %738 = vmatprep.mubr.f32.mxu1 %v2324_v44  ;;  %v936_v63 = vpop.f32.mrf.mxu0 }
 0x170   : > { %1012 = vst [vmem:[%s2431_s12 + $0x8] sm:$0xff] %v935_v31  ;;  %v937_v34 = vadd.f32 %v936_v63, %v2416_v52 }
 0x171   : > { %v938_v32 = vpop.f32.mrf.mxu0 }
 0x172   : > { %739 = vmatmul.mubr.f32.gmra.mxu1 %v2314_v41  ;;  %1013 = vst [vmem:[%s2431_s12 + $0x10] sm:$0xff] %v937_v34  ;;  %v939_v41 = vadd.f32 %v938_v32, %v2424_v59 }
 0x173   : > { %743 = vmatprep.mubr.f32.mxu1 %v2340_v54  ;;  %v942_v44 = vpop.f32.mrf.mxu0 }
 0x174   : > { %1014 = vst [vmem:[%s2431_s12 + $0x18] sm:$0xff] %v939_v41 }
 0x175   : > { %v944_v54 = vpop.f32.mrf.mxu0 }
 0x176   : > { %744 = vmatmul.mubr.f32.gmra.mxu1 %v2333_v51  ;;  %v943_v51 = vadd.f32 %v942_v44, %v2416_v52 }
 0x177   : > { %748 = vmatprep.mubr.f32.mxu1 %v2356_v1  ;;  %v946_v1 = vpop.f32.mrf.mxu0 }
 0x178   : > { %1015 = vst [vmem:[%s2431_s12 + $0x20] sm:$0xff] %v943_v51  ;;  %v947_v2 = vadd.f32 %v946_v1, %v2416_v52 }
 0x179   : > { %v948_v3 = vpop.f32.mrf.mxu0 }
 0x17a   : > { %749 = vmatmul.mubr.f32.gmra.mxu1 %v2349_v61  ;;  %v945_v61 = vadd.f32 %v944_v54, %v2424_v59  ;;  %v949_v4 = vadd.f32 %v948_v3, %v2424_v59  ;;  %1017 = vst [vmem:[%s2431_s12 + $0x30] sm:$0xff] %v947_v2 }
 0x17b   : > { %753 = vmatprep.mubr.f32.mxu1 %v2372_v11  ;;  %v952_v5 = vpop.f32.mrf.mxu0 }
 0x17c   : > { %1016 = vst [vmem:[%s2431_s12 + $0x28] sm:$0xff] %v945_v61  ;;  %1018 = vst [vmem:[%s2431_s12 + $0x38] sm:$0xff] %v949_v4  ;;  %v953_v6 = vadd.f32 %v952_v5, %v2416_v52 }
 0x17d   : > { %v954_v7 = vpop.f32.mrf.mxu0 }
 0x17e   : > { %754 = vmatmul.mubr.f32.gmra.mxu1 %v2365_v8  ;;  %v955_v8 = vadd.f32 %v954_v7, %v2424_v59  ;;  %1019 = vst [vmem:[%s2431_s12 + $0x40] sm:$0xff] %v953_v6 }
 0x17f   : > { %758 = vmatprep.mubr.f32.mxu1 %v2388_v21  ;;  %v956_v9 = vpop.f32.mrf.mxu0 }
 0x180   : > { %1020 = vst [vmem:[%s2431_s12 + $0x48] sm:$0xff] %v955_v8  ;;  %v957_v10 = vadd.f32 %v956_v9, %v2416_v52 }
 0x181   : > { %v958_v11 = vpop.f32.mrf.mxu0 }
 0x182   : > { %759 = vmatmul.mubr.f32.gmra.mxu1 %v2381_v18  ;;  %v959_v12 = vadd.f32 %v958_v11, %v2424_v59  ;;  %1021 = vst [vmem:[%s2431_s12 + $0x50] sm:$0xff] %v957_v10 }
 0x183   : > { %763 = vmatprep.mubr.f32.mxu1 %v590_v35  ;;  %v962_v13 = vpop.f32.mrf.mxu0 }
 0x184   : > { %1022 = vst [vmem:[%s2431_s12 + $0x58] sm:$0xff] %v959_v12  ;;  %v963_v14 = vadd.f32 %v962_v13, %v2416_v52 }
 0x185   : > { %v964_v15 = vpop.f32.mrf.mxu0 }
 0x186   : > { %764 = vmatmul.mubr.f32.gmra.mxu1 %v588_v0  ;;  %v965_v16 = vadd.f32 %v964_v15, %v2424_v59  ;;  %1023 = vst [vmem:[%s2431_s12 + $0x60] sm:$0xff] %v963_v14 }
 0x187   : > { %768 = vmatprep.mubr.f32.mxu1 %v594_v50  ;;  %v966_v17 = vpop.f32.mrf.mxu0 }
 0x188   : > { %1024 = vst [vmem:[%s2431_s12 + $0x68] sm:$0xff] %v965_v16  ;;  %v967_v18 = vadd.f32 %v966_v17, %v2416_v52 }
 0x189   : > { %v968_v19 = vpop.f32.mrf.mxu0 }
 0x18a   : > { %769 = vmatmul.mubr.f32.gmra.mxu1 %v592_v46  ;;  %v969_v20 = vadd.f32 %v968_v19, %v2424_v59  ;;  %1025 = vst [vmem:[%s2431_s12 + $0x70] sm:$0xff] %v967_v18 }
 0x18b   : > { %v972_v21 = vpop.f32.mrf.mxu0 }
 0x18c   : > { %1026 = vst [vmem:[%s2431_s12 + $0x78] sm:$0xff] %v969_v20  ;;  %v973_v22 = vadd.f32 %v972_v21, %v2416_v52 }
 0x18d   : > { %v974_v25 = vpop.f32.mrf.mxu0 }
 0x18e   : > { %v975_v26 = vadd.f32 %v974_v25, %v2424_v59  ;;  %1027 = vst [vmem:[%s2431_s12 + $0x80] sm:$0xff] %v973_v22 }
 0x18f   : > { %v976_v23 = vpop.f32.mrf.mxu0 }
 0x190   : > { %1028 = vst [vmem:[%s2431_s12 + $0x88] sm:$0xff] %v975_v26  ;;  %v977_v24 = vadd.f32 %v976_v23, %v2416_v52 }
 0x191   : > { %v978_v29 = vpop.f32.mrf.mxu0 }
 0x192   : > { %v979_v30 = vadd.f32 %v978_v29, %v2424_v59  ;;  %1029 = vst [vmem:[%s2431_s12 + $0x90] sm:$0xff] %v977_v24 }
 0x193   : > { %v982_v0 = vpop.f32.mrf.mxu0 }
 0x194   : > { %1030 = vst [vmem:[%s2431_s12 + $0x98] sm:$0xff] %v979_v30  ;;  %v983_v33 = vadd.f32 %v982_v0, %v2416_v52 }
 0x195   : > { %v984_v27 = vpop.f32.mrf.mxu0 }
 0x196   : > { %v985_v35 = vadd.f32 %v984_v27, %v2424_v59  ;;  %1031 = vst [vmem:[%s2431_s12 + $0xa0] sm:$0xff] %v983_v33 }
 0x197   : > { %v986_v36 = vpop.f32.mrf.mxu0 }
 0x198   : > { %1032 = vst [vmem:[%s2431_s12 + $0xa8] sm:$0xff] %v985_v35  ;;  %v987_v37 = vadd.f32 %v986_v36, %v2416_v52 }
 0x199   : > { %v988_v38 = vpop.f32.mrf.mxu0 }
 0x19a   : > { %v989_v39 = vadd.f32 %v988_v38, %v2424_v59  ;;  %1033 = vst [vmem:[%s2431_s12 + $0xb0] sm:$0xff] %v987_v37 }
 0x19b   : > { %v992_v40 = vpop.f32.mrf.mxu0 }
 0x19c   : > { %1034 = vst [vmem:[%s2431_s12 + $0xb8] sm:$0xff] %v989_v39  ;;  %v993_v42 = vadd.f32 %v992_v40, %v2416_v52 }
 0x19d   : > { %v994_v43 = vpop.f32.mrf.mxu0 }
 0x19e   : > { %v995_v45 = vadd.f32 %v994_v43, %v2424_v59  ;;  %1035 = vst [vmem:[%s2431_s12 + $0xc0] sm:$0xff] %v993_v42 }
 0x19f   : > { %v996_v46 = vpop.f32.mrf.mxu0 }
 0x1a0   : > { %1036 = vst [vmem:[%s2431_s12 + $0xc8] sm:$0xff] %v995_v45  ;;  %v997_v47 = vadd.f32 %v996_v46, %v2416_v52 }
 0x1a1   : > { %v998_v48 = vpop.f32.mrf.mxu0 }
 0x1a2   : > { %v999_v49 = vadd.f32 %v998_v48, %v2424_v59  ;;  %1037 = vst [vmem:[%s2431_s12 + $0xd0] sm:$0xff] %v997_v47 }
 0x1a3   : > { %v1002_v50 = vpop.f32.mrf.mxu0 }
 0x1a4   : > { %1038 = vst [vmem:[%s2431_s12 + $0xd8] sm:$0xff] %v999_v49  ;;  %v1003_v53 = vadd.f32 %v1002_v50, %v2416_v52 }
 0x1a5   : > { %v1004_v55 = vpop.f32.mrf.mxu0 }
 0x1a6   : > { %v1005_v56 = vadd.f32 %v1004_v55, %v2424_v59  ;;  %1039 = vst [vmem:[%s2431_s12 + $0xe0] sm:$0xff] %v1003_v53 }
 0x1a7   : > { %v1006_v57 = vpop.f32.mrf.mxu0 }
 0x1a8   : > { %1040 = vst [vmem:[%s2431_s12 + $0xe8] sm:$0xff] %v1005_v56  ;;  %v1007_v58 = vadd.f32 %v1006_v57, %v2416_v52 }
 0x1a9   : > { %v1008_v60 = vpop.f32.mrf.mxu0 }
 0x1aa   : > { %v1009_v28 = vadd.f32 %v1008_v60, %v2424_v59  ;;  %1041 = vst [vmem:[%s2431_s12 + $0xf0] sm:$0xff] %v1007_v58 }
 0x1ac   : > { %1042 = vst [vmem:[%s2431_s12 + $0xf8] sm:$0xff] %v1009_v28 }
 0x1ad   : > { %1894 = shalt.err (!%p1891_p10)
}
 0x1ae   : > { %s1895_s29 = scalar_lea.hbm %s2512_s23, 2048  ;;  %s1899_s22 = scalar_lea.hbm %s2654_s5, 4096 }
 0x1af   : > { %p1896_p6 = scmp.ne.s32.totalorder %s2512_s23, %s1895_s29  ;;  %p1900_p3 = scmp.lt.s32.totalorder %s2512_s23, %s2654_s5 }
 0x1b0   : > { %p1901_p11 = scmp.lt.s32.totalorder %s1899_s22, %s1895_s29 }
 0x1b1   : > { %p1897_p4 = pnand %p1896_p6, %p2683_p1 }
 0x1b2   : > { %p1902_p5 = por %p1901_p11, %p1900_p3 }
 0x1b3   : > { %p1898_p8 = pneg %p1897_p4 }
 0x1b5   : > { %p1903_p7 = pnand %p1902_p5, %p1898_p8 }
 0x1b7   : > { %1906 = shalt.err (!%p1903_p7)
}
 0x1b8   : > { %s2019_s17 = smov 128   ;;  %s2020_s30 = smov 8  }
 0x1b9   : > { %1647 = dma.vmem_to_hbm [thread:$0]  (%p2683_p1), %s2515_s18, 2048, %s2512_s23, %s1217_s10, %s2019_s17, %s2019_s17, %s2020_s30  }
 0x1ba   : > { %s2544_s11 = scalar_lea.vmem [#allocation11], %s2217_s1  ;;  %s1221_s19 = sand.u32 1, %s2086_s28  }
 0x1bb   : > { %s1257_s1 = sshll.u32 %s2544_s11, 4  ;;  %s1536_s23 = sshll.u32 %s2086_s28, 12  ;;  %s2572_s1 = int_to_ptr.vmem [resolvable:$true] %s1257_s1 }
 0x1bc   : > { %s1274_s18 = sshll.u32 %s2431_s12, 4  ;;  %s2684_s10 = sshll.u32 %s2086_s28, 11  ;;  %s2579_s18 = int_to_ptr.vmem [resolvable:$true] %s1274_s18 }
 0x1bd   : > { %s2570_s13 = scalar_lea.hbm %s2655_s6, %s2684_s10  ;;  %s2577_s16 = scalar_lea.hbm %s2656_s7, %s1536_s23 }
 0x1be   : > { %s2582_s28 = scalar_lea.sflag [#allocation12], %s1221_s19  ;;  %s1907_s12 = scalar_lea.vmem %s2572_s1, 2048 }
 0x1bf   : > { %p1908_p12 = scmp.ne.s32.totalorder %s2572_s1, %s1907_s12  ;;  %s2021_s10 = smov [#allocation11]  }
 0x1c0   : > { %s1911_s9 = sshll.u32 %s2021_s10, 4  ;;  %s1912_s9 = int_to_ptr.vmem [resolvable:$false] %s1911_s9 }
 0x1c1   : > { %p1909_p9 = pnand %p1908_p12, %p2683_p1  ;;  %s1913_s29 = scalar_lea.vmem %s1912_s9, 4096 }
 0x1c2   : > { %p1914_p0 = scmp.lt.s32.totalorder %s2572_s1, %s1912_s9  ;;  %p1915_p2 = scmp.lt.s32.totalorder %s1913_s29, %s1907_s12 }
 0x1c3   : > { %p1910_p13 = pneg %p1909_p9 }
 0x1c4   : > { %p1916_p10 = por %p1915_p2, %p1914_p0 }
 0x1c6   : > { %p1917_p6 = pnand %p1916_p10, %p1910_p13 }
 0x20e   : > { %v1569_v52 = vpop.f32.mrf.mxu1 }
 0x210   : > { %v1570_v59 = vpop.f32.mrf.mxu1 }
 0x211   : > { %v1571_v62 = vadd.f32 %v1570_v59, %v1569_v52 }
 0x212   : > { %v1572_v31 = vpop.f32.mrf.mxu1 }
 0x213   : > { %774 = vst [vmem:[%s2544_s11] sm:$0xff] %v1571_v62 }
 0x214   : > { %v1573_v63 = vpop.f32.mrf.mxu1 }
 0x215   : > { %v1574_v34 = vadd.f32 %v1573_v63, %v1572_v31 }
 0x216   : > { %v1575_v32 = vpop.f32.mrf.mxu1 }
 0x217   : > { %775 = vst [vmem:[%s2544_s11 + $0x8] sm:$0xff] %v1574_v34 }
 0x218   : > { %v1576_v41 = vpop.f32.mrf.mxu1 }
 0x219   : > { %v1577_v44 = vadd.f32 %v1576_v41, %v1575_v32 }
 0x21a   : > { %v1578_v51 = vpop.f32.mrf.mxu1 }
 0x21b   : > { %776 = vst [vmem:[%s2544_s11 + $0x10] sm:$0xff] %v1577_v44 }
 0x21c   : > { %v1579_v54 = vpop.f32.mrf.mxu1 }
 0x21d   : > { %v1580_v61 = vadd.f32 %v1579_v54, %v1578_v51 }
 0x21e   : > { %v1581_v1 = vpop.f32.mrf.mxu1 }
 0x21f   : > { %777 = vst [vmem:[%s2544_s11 + $0x18] sm:$0xff] %v1580_v61 }
 0x220   : > { %v1582_v2 = vpop.f32.mrf.mxu1 }
 0x221   : > { %v1583_v3 = vadd.f32 %v1582_v2, %v1581_v1 }
 0x222   : > { %v1584_v4 = vpop.f32.mrf.mxu1 }
 0x223   : > { %778 = vst [vmem:[%s2544_s11 + $0x20] sm:$0xff] %v1583_v3 }
 0x224   : > { %v1585_v5 = vpop.f32.mrf.mxu1 }
 0x225   : > { %v1586_v6 = vadd.f32 %v1585_v5, %v1584_v4 }
 0x226   : > { %v1587_v7 = vpop.f32.mrf.mxu1 }
 0x227   : > { %779 = vst [vmem:[%s2544_s11 + $0x28] sm:$0xff] %v1586_v6 }
 0x228   : > { %v1588_v8 = vpop.f32.mrf.mxu1 }
 0x229   : > { %v1589_v9 = vadd.f32 %v1588_v8, %v1587_v7 }
 0x22a   : > { %v1590_v10 = vpop.f32.mrf.mxu1 }
 0x22b   : > { %780 = vst [vmem:[%s2544_s11 + $0x30] sm:$0xff] %v1589_v9 }
 0x22c   : > { %v1591_v11 = vpop.f32.mrf.mxu1 }
 0x22d   : > { %v1592_v12 = vadd.f32 %v1591_v11, %v1590_v10 }
 0x22e   : > { %v1593_v13 = vpop.f32.mrf.mxu1 }
 0x22f   : > { %781 = vst [vmem:[%s2544_s11 + $0x38] sm:$0xff] %v1592_v12 }
 0x230   : > { %v1594_v14 = vpop.f32.mrf.mxu1 }
 0x231   : > { %v1595_v15 = vadd.f32 %v1594_v14, %v1593_v13 }
 0x232   : > { %v1596_v16 = vpop.f32.mrf.mxu1 }
 0x233   : > { %782 = vst [vmem:[%s2544_s11 + $0x40] sm:$0xff] %v1595_v15 }
 0x234   : > { %v1597_v17 = vpop.f32.mrf.mxu1 }
 0x235   : > { %v1598_v18 = vadd.f32 %v1597_v17, %v1596_v16 }
 0x236   : > { %v1599_v19 = vpop.f32.mrf.mxu1 }
 0x237   : > { %783 = vst [vmem:[%s2544_s11 + $0x48] sm:$0xff] %v1598_v18 }
 0x238   : > { %v1600_v20 = vpop.f32.mrf.mxu1 }
 0x239   : > { %v1601_v21 = vadd.f32 %v1600_v20, %v1599_v19 }
 0x23a   : > { %v1602_v22 = vpop.f32.mrf.mxu1 }
 0x23b   : > { %784 = vst [vmem:[%s2544_s11 + $0x50] sm:$0xff] %v1601_v21 }
 0x23c   : > { %v1603_v25 = vpop.f32.mrf.mxu1 }
 0x23d   : > { %v1604_v26 = vadd.f32 %v1603_v25, %v1602_v22 }
 0x23e   : > { %v1605_v23 = vpop.f32.mrf.mxu1 }
 0x23f   : > { %785 = vst [vmem:[%s2544_s11 + $0x58] sm:$0xff] %v1604_v26 }
 0x240   : > { %v1606_v24 = vpop.f32.mrf.mxu1 }
 0x241   : > { %v1607_v29 = vadd.f32 %v1606_v24, %v1605_v23 }
 0x242   : > { %v1608_v30 = vpop.f32.mrf.mxu1 }
 0x243   : > { %786 = vst [vmem:[%s2544_s11 + $0x60] sm:$0xff] %v1607_v29 }
 0x244   : > { %v1609_v0 = vpop.f32.mrf.mxu1 }
 0x245   : > { %v1610_v33 = vadd.f32 %v1609_v0, %v1608_v30 }
 0x246   : > { %v1611_v27 = vpop.f32.mrf.mxu1 }
 0x247   : > { %787 = vst [vmem:[%s2544_s11 + $0x68] sm:$0xff] %v1610_v33 }
 0x248   : > { %v1612_v35 = vpop.f32.mrf.mxu1 }
 0x249   : > { %v1613_v36 = vadd.f32 %v1612_v35, %v1611_v27 }
 0x24a   : > { %v1614_v37 = vpop.f32.mrf.mxu1 }
 0x24b   : > { %788 = vst [vmem:[%s2544_s11 + $0x70] sm:$0xff] %v1613_v36 }
 0x24c   : > { %v1615_v38 = vpop.f32.mrf.mxu1 }
 0x24d   : > { %v1616_v39 = vadd.f32 %v1615_v38, %v1614_v37 }
 0x24f   : > { %789 = vst [vmem:[%s2544_s11 + $0x78] sm:$0xff] %v1616_v39 }
 0x250   : > { %1920 = shalt.err (!%p1917_p6)
}
 0x251   : > { %s1921_s11 = scalar_lea.hbm %s2570_s13, 2048  ;;  %s1925_s15 = scalar_lea.hbm %s2655_s6, 4096 }
 0x252   : > { %p1922_p4 = scmp.ne.s32.totalorder %s2570_s13, %s1921_s11  ;;  %p1926_p11 = scmp.lt.s32.totalorder %s2570_s13, %s2655_s6 }
 0x253   : > { %p1927_p5 = scmp.lt.s32.totalorder %s1925_s15, %s1921_s11 }
 0x254   : > { %p1923_p8 = pnand %p1922_p4, %p2683_p1 }
 0x255   : > { %p1928_p7 = por %p1927_p5, %p1926_p11 }
 0x256   : > { %p1924_p3 = pneg %p1923_p8 }
 0x258   : > { %p1929_p12 = pnand %p1928_p7, %p1924_p3 }
 0x25a   : > { %1932 = shalt.err (!%p1929_p12)
}
 0x25b   : > { %1648 = dma.vmem_to_hbm [thread:$0]  (%p2683_p1), %s2572_s1, 2048, %s2570_s13, %s2582_s28, %s2019_s17, %s2019_s17, %s2020_s30  }
 0x25c   : > { %s1933_s12 = scalar_lea.vmem %s2579_s18, 4096  ;;  %s2022_s9 = smov [#allocation13]  }
 0x25d   : > { %p1934_p9 = scmp.ne.s32.totalorder %s2579_s18, %s1933_s12  ;;  %s1937_s29 = sshll.u32 %s2022_s9, 4  ;;  %s1938_s29 = int_to_ptr.vmem [resolvable:$false] %s1937_s29 }
 0x25e   : > { %s1939_s11 = scalar_lea.vmem %s1938_s29, 8192  ;;  %p1940_p2 = scmp.lt.s32.totalorder %s2579_s18, %s1938_s29 }
 0x25f   : > { %p1935_p13 = pnand %p1934_p9, %p2683_p1  ;;  %p1941_p10 = scmp.lt.s32.totalorder %s1939_s11, %s1933_s12 }
 0x261   : > { %p1936_p0 = pneg %p1935_p13  ;;  %p1942_p6 = por %p1941_p10, %p1940_p2 }
 0x263   : > { %p1943_p4 = pnand %p1942_p6, %p1936_p0 }
 0x265   : > { %1946 = shalt.err (!%p1943_p4)
}
 0x266   : > { %s1947_s19 = scalar_lea.hbm %s2577_s16, 4096  ;;  %s1951_s1 = scalar_lea.hbm %s2656_s7, 8192 }
 0x267   : > { %p1948_p8 = scmp.ne.s32.totalorder %s2577_s16, %s1947_s19  ;;  %p1952_p5 = scmp.lt.s32.totalorder %s2577_s16, %s2656_s7 }
 0x268   : > { %p1953_p7 = scmp.lt.s32.totalorder %s1951_s1, %s1947_s19 }
 0x269   : > { %p1949_p3 = pnand %p1948_p8, %p2683_p1 }
 0x26a   : > { %p1954_p12 = por %p1953_p7, %p1952_p5 }
 0x26b   : > { %p1950_p11 = pneg %p1949_p3 }
 0x26d   : > { %p1955_p9 = pnand %p1954_p12, %p1950_p11 }
 0x26f   : > { %1958 = shalt.err (!%p1955_p9)
}
 0x270   : > { %s2023_s15 = smov 256   ;;  %s2024_s22 = smov 16  }
 0x271   : > { %1649 = dma.vmem_to_hbm [thread:$0]  (%p2683_p1), %s2579_s18, 4096, %s2577_s16, %s2582_s28, %s2023_s15, %s2023_s15, %s2024_s22  }
 0x272 PF: > { %s1289_s10 = sand.u32 1, %s1997_s24   ;;  %p2685_p13 = scmp.ne.s32.totalorder %s2667_s8, 0 }
 0x273   : > { %p2686_p0 = scmp.ge.s32.totalorder %s2009_s27, 2  ;;  %s1290_s12 = scalar_lea.sflag [#allocation4], %s1289_s10 }
 0x275   : > { %p1668_p2 = pnand %p2686_p0, %p2685_p13 }
 0x277   : > { %p1669_p10 = pneg %p1668_p2 }
 0x279   : > { %1988 = dma.done.wait (%p1669_p10), %s1290_s12, 2048  }
 0x27a   : > { %1990 = vsyncadd (%p1669_p10), %s1290_s12, 4294965248  ;;  %s2687_s9 = sadd.s32 4294967294, %s2009_s27  }
 0x27b   : > { %s1298_s29 = sand.u32 1, %s2687_s9  }
 0x27c   : > { %s1299_s11 = scalar_lea.sflag [#allocation12], %s1298_s29 }
 0x27d   : > { %1992 = dma.done.wait (%p1669_p10), %s1299_s11, 6144  }
 0x27e   : > { %1994 = vsyncadd (%p1669_p10), %s1299_s11, 4294961152  ;;  %p26_p1 = scmp.ge.s32.totalorder %s2156_s14, 4   ;;  %s2688_s24 = smov %s2001_s25 }
 0x27f   : > { %s2689_s25 = smov %s2005_s26  ;;  %s2690_s26 = smov %s2166_s20 }
 0x280   : > { %s2691_s27 = smov %s2156_s14  ;;  %28 = sbr.rel (!%p26_p1) target bundleno = 11 (0xb), region = 129 }
 0x285   :  { %1313 = vsyncpa [#allocation3], 1 }
 0x286   :  { %1315 = vsyncpa [#allocation3 + $0x1], 1 }
 0x287   :  { %1316 = vsyncpa [#allocation6], 1 }
 0x288   :  { %1317 = vsyncpa [#allocation9], 1 }
 0x289   :  { %1318 = vsyncpa [#allocation4], 1 }
 0x28a   :  { %1320 = vsyncpa [#allocation4 + $0x1], 1 }
 0x28b   :  { %1321 = vsyncpa [#allocation12], 1 }
 0x28c   :  { %1323 = vsyncpa [#allocation12 + $0x1], 1 }

</bundles_post_ra>
